<compile_context>
chip_gen: v5e
topology: v5e:2x2
jax: 0.10.0
libtpu: 0.0.40
codegen_flags: <defaults>
</compile_context>

<pallas_src>
import jax
import jax.numpy as jnp
from jax.experimental import pallas as pl
from jax.experimental.pallas import tpu as pltpu

# ---------------- config (small, consistent with the module) ----------------
LABELS = ["a", "b", "c"]          # len(labels) = 3
WINDOW_SIZES = [1, 2, 3, 4, 5]
IN_CHANNELS = 4                    # num_bert_states
OUT_CHANNELS = 32
B = 2                              # batch
S = 8                              # seq_len
H = 128                            # BERT hidden size (small synthetic)
L = len(LABELS)
NW = len(WINDOW_SIZES)
F = NW * OUT_CHANNELS              # 160
K = IN_CHANNELS * H                # 512 (one window offset's contraction slice)
MAX_WS = max(WINDOW_SIZES)
KW = MAX_WS * K                    # 2560, contraction dim of the fused conv matmul
GPAD = 256                         # conv-output column group, padded 160 -> 256 (lane aligned)
LPAD = 128                         # padded logit width (lane-dense output store)


def bert_cnn_kernel(xw_ref,       # (B*S, KW)      window-expanded hidden states
                    wf_ref,       # (KW, GPAD)     fused conv weights (all convs, all offsets)
                    bias_ref,     # (2, GPAD)      row0: conv biases, row1[:LPAD]: out bias
                    mask_ref,     # (B*S, GPAD)    1.0 where the conv window is valid
                    wo_ref,       # (GPAD, LPAD)   zero-padded output-layer weight
                    o_ref):       # (B, LPAD)
    # One MXU matmul covering all 5 convs and all window offsets.
    y = jnp.dot(xw_ref[...], wf_ref[...],
                preferred_element_type=jnp.float32)            # (B*S, GPAD)

    biases = bias_ref[...]
    y = jnp.maximum(y + biases[0:1, :], 0.0)                   # + conv bias, ReLU
    y = y * mask_ref[...]                                      # drop invalid window positions

    # Temporal max-pool per batch row (ReLU output >= 0, so masked zeros are inert).
    # Each slice is an aligned 8-sublane block -> cheap XLU reductions.
    pooled = jnp.concatenate(
        [jnp.max(y[b * S:(b + 1) * S, :], axis=0, keepdims=True) for b in range(B)],
        axis=0)                                                # (B, GPAD)

    # Eval-mode dropout == identity.  Final Linear; lane-dense (B, 128) store.
    logits = jnp.dot(pooled, wo_ref[...], preferred_element_type=jnp.float32)
    logits = logits + biases[1:2, 0:LPAD]
    o_ref[...] = logits.astype(o_ref.dtype)


def bert_cnn_forward(x_nchw, conv_ws, conv_b, w_out, b_out):
    """x_nchw: (B, C, S, H) stacked BERT hidden states (NCHW, as in the torch code)."""
    # --- glue: relayout / fuse parameters outside the kernel (layout plumbing only) ---
    # (B, C, S, H) -> (B, S, C*H)
    x_bsk = jnp.transpose(x_nchw, (0, 2, 1, 3)).reshape(B, S, K)

    # Window expansion: group w holds rows shifted up by w (zero fill past seq end),
    # so the kernel needs no sublane shifts at all.
    groups = []
    for w in range(MAX_WS):
        if w == 0:
            g = x_bsk
        else:
            g = jnp.concatenate(
                [x_bsk[:, w:, :], jnp.zeros((B, w, K), x_bsk.dtype)], axis=1)
        groups.append(g)
    xw = jnp.concatenate(groups, axis=2).reshape(B * S, KW)     # (B*S, MAX_WS*K)

    # Fused conv weight: rows grouped by window offset w; inside the output group conv i
    # occupies lanes [i*32, (i+1)*32); (conv i, offset w >= ws_i) blocks stay zero.
    wf = jnp.zeros((KW, GPAD), jnp.float32)
    for w in range(MAX_WS):
        for i, ws in enumerate(WINDOW_SIZES):
            if w < ws:
                blk = jnp.transpose(conv_ws[i][:, :, w, :], (1, 2, 0)).reshape(K, OUT_CHANNELS)
                wf = wf.at[w * K:(w + 1) * K,
                           i * OUT_CHANNELS:(i + 1) * OUT_CHANNELS].set(blk)

    # Small params folded into a single (2, GPAD) input: conv biases + output bias.
    biases = jnp.zeros((2, GPAD), jnp.float32)
    for i in range(NW):
        biases = biases.at[0, i * OUT_CHANNELS:(i + 1) * OUT_CHANNELS].set(conv_b[i])
    biases = biases.at[1, :L].set(b_out[0])

    # Validity mask: position t of a batch row is valid for conv i iff t <= S - ws_i.
    t_idx = jnp.tile(jnp.arange(S), B)                              # (B*S,)
    limits = jnp.full((GPAD,), -1, jnp.int32)
    for i, ws in enumerate(WINDOW_SIZES):
        limits = limits.at[i * OUT_CHANNELS:(i + 1) * OUT_CHANNELS].set(S - ws)
    mask = (t_idx[:, None] <= limits[None, :]).astype(jnp.float32)  # (B*S, GPAD)

    # Output-layer weight, zero-padded to a lane-dense (GPAD, 128) block.
    wo = jnp.zeros((GPAD, LPAD), jnp.float32)
    wo = wo.at[:F, :L].set(w_out)

    out = pl.pallas_call(
        bert_cnn_kernel,
        out_shape=jax.ShapeDtypeStruct((B, LPAD), jnp.float32),
        in_specs=[pl.BlockSpec(memory_space=pltpu.MemorySpace.VMEM)] * 5,
        out_specs=pl.BlockSpec(memory_space=pltpu.MemorySpace.VMEM),
    )(xw, wf, biases, mask, wo)
    return out[:, :L]


def reference_forward(x_nchw, conv_ws, conv_b, w_out, b_out):
    """Pure-JAX reference matching the PyTorch forward (eval mode)."""
    feats = []
    for i, W in enumerate(conv_ws):                           # W: (O, C, ws, H)
        ws = W.shape[2]
        T = S - ws + 1
        cols = []
        for t in range(T):
            patch = x_nchw[:, :, t:t + ws, :]                 # (B, C, ws, H)
            cols.append(jnp.einsum("bcwh,ocwh->bo", patch, W))
        conv = jnp.stack(cols, axis=2) + conv_b[i][None, :, None]  # (B, O, T)
        relu = jnp.maximum(conv, 0.0)
        feats.append(jnp.max(relu, axis=2))                   # (B, O)
    cat = jnp.concatenate(feats, axis=1)                      # (B, F)
    return cat @ w_out + b_out[0]                             # (B, L)


if __name__ == "__main__":
    key = jax.random.PRNGKey(0)
    keys = jax.random.split(key, 4 + 2 * NW)

    # synthetic "stacked last-4 BERT hidden states", NCHW like the torch code
    x = jax.random.normal(keys[0], (B, IN_CHANNELS, S, H), dtype=jnp.float32)

    # conv params, PyTorch Conv2d weight shape (O, C, ws, H)
    conv_ws = []
    for i, ws in enumerate(WINDOW_SIZES):
        conv_ws.append(0.05 * jax.random.normal(
            keys[1 + i], (OUT_CHANNELS, IN_CHANNELS, ws, H), dtype=jnp.float32))
    conv_b = 0.1 * jax.random.normal(
        keys[1 + NW], (NW, OUT_CHANNELS), dtype=jnp.float32)

    # output Linear params (stored directly as (F, L) == weight.T)
    w_out = 0.05 * jax.random.normal(keys[2 + NW], (F, L), dtype=jnp.float32)
    b_out = 0.1 * jax.random.normal(keys[3 + NW], (1, L), dtype=jnp.float32)

    preds = bert_cnn_forward(x, conv_ws, conv_b, w_out, b_out)
    preds = jax.block_until_ready(preds)

    ref = reference_forward(x, conv_ws, conv_b, w_out, b_out)
    assert preds.shape == (B, L)
    assert jnp.allclose(preds, ref, atol=1e-4, rtol=1e-4), "mismatch vs reference"

    print("KERNEL_OK")
</pallas_src>

<mosaic_0001>
module attributes {stable_mosaic.version = 11 : i64} {
  func.func @bert_cnn_kernel(%arg0: memref<16x2560xf32, #tpu.memory_space<vmem>>, %arg1: memref<2560x256xf32, #tpu.memory_space<vmem>>, %arg2: memref<2x256xf32, #tpu.memory_space<vmem>>, %arg3: memref<16x256xf32, #tpu.memory_space<vmem>>, %arg4: memref<256x128xf32, #tpu.memory_space<vmem>>, %arg5: memref<2x128xf32, #tpu.memory_space<vmem>>) attributes {dimension_semantics = [], scalar_prefetch = 0 : i64, scratch_operands = 0 : i64, tpu.core_type = #tpu.core_type<tc>} {
    %c0 = arith.constant 0 : index
    %c0_0 = arith.constant 0 : index
    %0 = vector.load %arg0[%c0, %c0_0] : memref<16x2560xf32, #tpu.memory_space<vmem>>, vector<16x2560xf32>
    %c0_1 = arith.constant 0 : index
    %c0_2 = arith.constant 0 : index
    %1 = vector.load %arg1[%c0_1, %c0_2] : memref<2560x256xf32, #tpu.memory_space<vmem>>, vector<2560x256xf32>
    %cst = arith.constant dense<0.000000e+00> : vector<16x256xf32>
    %2 = tpu.matmul %0, %1, %cst {dimension_numbers = #tpu.dot_dimension_numbers<[1], [0], [0], [1], [0, 0, 1, 1], [], []>} : vector<16x2560xf32>, vector<2560x256xf32>, vector<16x256xf32> -> vector<16x256xf32>
    %c0_3 = arith.constant 0 : index
    %c0_4 = arith.constant 0 : index
    %3 = vector.load %arg2[%c0_3, %c0_4] : memref<2x256xf32, #tpu.memory_space<vmem>>, vector<2x256xf32>
    %4 = vector.extract_strided_slice %3 {offsets = [0, 0], sizes = [1, 256], strides = [1, 1]} : vector<2x256xf32> to vector<1x256xf32>
    %5 = vector.broadcast %4 : vector<1x256xf32> to vector<16x256xf32>
    %6 = arith.addf %2, %5 : vector<16x256xf32>
    %cst_5 = arith.constant 0.000000e+00 : f32
    %7 = vector.broadcast %cst_5 : f32 to vector<16x256xf32>
    %8 = arith.maximumf %6, %7 : vector<16x256xf32>
    %c0_6 = arith.constant 0 : index
    %c0_7 = arith.constant 0 : index
    %9 = vector.load %arg3[%c0_6, %c0_7] : memref<16x256xf32, #tpu.memory_space<vmem>>, vector<16x256xf32>
    %10 = arith.mulf %8, %9 : vector<16x256xf32>
    %11 = vector.extract_strided_slice %10 {offsets = [0, 0], sizes = [8, 256], strides = [1, 1]} : vector<16x256xf32> to vector<8x256xf32>
    %cst_8 = arith.constant dense<0xFF800000> : vector<256xf32>
    %12 = vector.multi_reduction <maximumf>, %11, %cst_8 [0] : vector<8x256xf32> to vector<256xf32>
    %13 = vector.shape_cast %12 : vector<256xf32> to vector<1x256xf32>
    %14 = vector.extract_strided_slice %10 {offsets = [8, 0], sizes = [8, 256], strides = [1, 1]} : vector<16x256xf32> to vector<8x256xf32>
    %cst_9 = arith.constant dense<0xFF800000> : vector<256xf32>
    %15 = vector.multi_reduction <maximumf>, %14, %cst_9 [0] : vector<8x256xf32> to vector<256xf32>
    %16 = vector.shape_cast %15 : vector<256xf32> to vector<1x256xf32>
    %17 = tpu.concatenate %13, %16 in 0 : vector<1x256xf32>, vector<1x256xf32> -> vector<2x256xf32>
    %c0_10 = arith.constant 0 : index
    %c0_11 = arith.constant 0 : index
    %18 = vector.load %arg4[%c0_10, %c0_11] : memref<256x128xf32, #tpu.memory_space<vmem>>, vector<256x128xf32>
    %cst_12 = arith.constant dense<0.000000e+00> : vector<2x128xf32>
    %19 = tpu.matmul %17, %18, %cst_12 {dimension_numbers = #tpu.dot_dimension_numbers<[1], [0], [0], [1], [0, 0, 1, 1], [], []>} : vector<2x256xf32>, vector<256x128xf32>, vector<2x128xf32> -> vector<2x128xf32>
    %20 = vector.extract_strided_slice %3 {offsets = [1, 0], sizes = [1, 128], strides = [1, 1]} : vector<2x256xf32> to vector<1x128xf32>
    %21 = vector.broadcast %20 : vector<1x128xf32> to vector<2x128xf32>
    %22 = arith.addf %19, %21 : vector<2x128xf32>
    %c0_13 = arith.constant 0 : index
    %c0_14 = arith.constant 0 : index
    %23 = vector.load %arg5[%c0_13, %c0_14] : memref<2x128xf32, #tpu.memory_space<vmem>>, vector<2x128xf32>
    tpu.vector_store %arg5[%c0_13, %c0_14], %22 {strides = array<i32>} : memref<2x128xf32, #tpu.memory_space<vmem>>, vector<2x128xf32>,
    return
  }
}

</mosaic_0001>

<bundles_post_ra>
// kernel: tpu_custom_call.1
= control target key start
LH: loop header
LB: loop body
LE: loop exit
PB: predicated region body
PF: predicated region fallthrough
CT: control target
= control target key end

     0   :  { %10 = vsyncpa [#allocation3], 0  ;;  %s2204_s0 = inlined_call_operand.hbm [shape: f32[16,2560], index: 0, kind: input, shape index: {}]   ;;  %s2205_s1 = inlined_call_operand.hbm [shape: f32[2560,256], index: 1, kind: input, shape index: {}]   ;;  %s2206_s2 = inlined_call_operand.hbm [shape: f32[2,256], index: 2, kind: input, shape index: {}]   ;;  %s2207_s3 = inlined_call_operand.hbm [shape: f32[16,256], index: 3, kind: input, shape index: {}]   ;;  %s2208_s4 = inlined_call_operand.hbm [shape: f32[256,128], index: 4, kind: input, shape index: {}]   ;;  %s2209_s5 = inlined_call_operand.hbm [shape: f32[2,128], index: 5, kind: output, shape index: {}]  }
   0x1   :  { %11 = vsyncpa [#allocation6], 0 }
   0x2   :  { %12 = vsyncpa [#allocation9], 0  ;;  %s31_s20 = sshll.u32 %s2205_s1, 4  ;;  %s32_s20 = int_to_ptr.hbm [resolvable:$true] %s31_s20 }
   0x3   :  { %13 = vsyncpa [#allocation4], 0  ;;  %s2042_s21 = smov [#allocation5]   ;;  %s55_s25 = sshll.u32 %s2207_s3, 4  ;;  %s56_s25 = int_to_ptr.hbm [resolvable:$true] %s55_s25 }
   0x4   :  { %s33_s22 = sshll.u32 %s2042_s21, 4  ;;  %s2043_s26 = smov 256   ;;  %s34_s22 = int_to_ptr.vmem [resolvable:$true] %s33_s22 }
   0x5   :  { %s2044_s27 = smov 16   ;;  %s2045_s28 = smov [#allocation8]  }
   0x6   :  { %39 = dma.hbm_to_vmem [thread:$0]  %s32_s20, 81920, %s34_s22, [#allocation6], %s2043_s26, %s2043_s26, %s2044_s27  }
   0x7   :  { %s57_s29 = sshll.u32 %s2045_s28, 4  ;;  %s18_s7 = sshll.u32 %s2204_s0, 4  ;;  %s58_s29 = int_to_ptr.vmem [resolvable:$true] %s57_s29  ;;  %s19_s7 = int_to_ptr.hbm [resolvable:$true] %s18_s7 }
   0x8   :  { %63 = dma.hbm_to_vmem [thread:$0]  %s56_s25, 512, %s58_s29, [#allocation9], %s2043_s26, %s2043_s26, %s2044_s27  }
   0x9   :  { %s2046_s1 = smov [#allocation2]   ;;  %s45_s3 = sshll.u32 %s2206_s2, 4  ;;  %s46_s3 = int_to_ptr.hbm [resolvable:$true] %s45_s3 }
   0xa   :  { %s20_s8 = sshll.u32 %s2046_s1, 4  ;;  %s2047_s11 = smov 2560   ;;  %s21_s8 = int_to_ptr.vmem [resolvable:$true] %s20_s8 }
   0xb   :  { %s2048_s12 = smov 160   ;;  %s2049_s13 = smov [#allocation7]  }
   0xc   :  { %26 = dma.hbm_to_vmem [thread:$0]  %s19_s7, 5120, %s21_s8, [#allocation3], %s2047_s11, %s2047_s11, %s2048_s12  }
   0xd   :  { %s47_s14 = sshll.u32 %s2049_s13, 4  ;;  %s68_s0 = sshll.u32 %s2208_s4, 4  ;;  %s48_s14 = int_to_ptr.vmem [resolvable:$true] %s47_s14  ;;  %s69_s0 = int_to_ptr.hbm [resolvable:$true] %s68_s0 }
   0xe   :  { %50 = dma.hbm_to_vmem [thread:$0]  %s46_s3, 64, %s48_s14, [#allocation6]  }
   0xf   :  { %s2050_s17 = smov [#allocation10]   ;;  %s2051_s19 = smov 128  }
  0x10   :  { %s70_s18 = sshll.u32 %s2050_s17, 4  ;;  %s2052_s20 = smov 8   ;;  %s71_s18 = int_to_ptr.vmem [resolvable:$true] %s70_s18 }
  0x11   :  { %76 = dma.hbm_to_vmem [thread:$0]  %s69_s0, 4096, %s71_s18, [#allocation9], %s2051_s19, %s2051_s19, %s2052_s20  }
  0x12   :  { %2034 = dma.done.wait [#allocation3], 5120  }
  0x13   :  { %2035 = vsyncadd [#allocation3], 4294962176 }
  0x14   :  { %2036 = dma.done.wait [#allocation6], 81984  }
  0x15   :  { %2037 = vsyncadd [#allocation6], 4294885312 }
  0x16   :  { %2038 = dma.done.wait [#allocation9], 4608  }
  0x17   :  { %2039 = vsyncadd [#allocation9], 4294962688  ;;  %v167_v0 = vld [vmem:[#allocation5 + $0xf0] sm:$0xff]  ;;  %v165_v2 = vld [vmem:[#allocation5 + $0xe0] sm:$0xff]  ;;  %vm1741_vm0 = vcmask 1040384   ;;  %s2053_s2 = smov [#allocation11]  }
  0x18   :  { %v231_v1 = vld [vmem:[#allocation5 + $0x2f0] sm:$0xff]  ;;  %785 = vmatpush.msra.mxu0 %v167_v0  ;;  %v229_v4 = vld [vmem:[#allocation5 + $0x2e0] sm:$0xff]  ;;  %s1823_s4 = sshll.u32 %s2053_s2, 4  ;;  %s1825_s23 = sshll.u32 %s2209_s5, 4  ;;  %s1824_s4 = int_to_ptr.vmem [resolvable:$true] %s1823_s4  ;;  %s1826_s23 = int_to_ptr.hbm [resolvable:$true] %s1825_s23 }
  0x19   :  { %831 = vmatpush.msra.mxu2 %v231_v1  ;;  %v199_v3 = vld [vmem:[#allocation5 + $0x1f0] sm:$0xff]  ;;  %v197_v7 = vld [vmem:[#allocation5 + $0x1e0] sm:$0xff] }
  0x1a   :  { %v263_v5 = vld [vmem:[#allocation5 + $0x3f0] sm:$0xff]  ;;  %808 = vmatpush.msra.mxu1 %v199_v3  ;;  %786 = vmatpush.msra.mxu0 %v165_v2  ;;  %v261_v9 = vld [vmem:[#allocation5 + $0x3e0] sm:$0xff] }
  0x1b   :  { %854 = vmatpush.msra.mxu3 %v263_v5  ;;  %v163_v6 = vld [vmem:[#allocation5 + $0xd0] sm:$0xff]  ;;  %832 = vmatpush.msra.mxu2 %v229_v4  ;;  %v161_v11 = vld [vmem:[#allocation5 + $0xc0] sm:$0xff] }
  0x1c   :  { %v227_v8 = vld [vmem:[#allocation5 + $0x2d0] sm:$0xff]  ;;  %809 = vmatpush.msra.mxu1 %v197_v7  ;;  %v225_v12 = vld [vmem:[#allocation5 + $0x2c0] sm:$0xff]  ;;  %787 = vmatpush.msra.mxu0 %v163_v6 }
  0x1d   :  { %v195_v10 = vld [vmem:[#allocation5 + $0x1d0] sm:$0xff]  ;;  %855 = vmatpush.msra.mxu3 %v261_v9  ;;  %833 = vmatpush.msra.mxu2 %v227_v8  ;;  %v193_v14 = vld [vmem:[#allocation5 + $0x1c0] sm:$0xff] }
  0x1e   :  { %v259_v13 = vld [vmem:[#allocation5 + $0x3d0] sm:$0xff]  ;;  %v257_v15 = vld [vmem:[#allocation5 + $0x3c0] sm:$0xff]  ;;  %810 = vmatpush.msra.mxu1 %v195_v10  ;;  %788 = vmatpush.msra.mxu0 %v161_v11 }
  0x1f   :  { %856 = vmatpush.msra.mxu3 %v259_v13  ;;  %v159_v16 = vld [vmem:[#allocation5 + $0xb0] sm:$0xff]  ;;  %834 = vmatpush.msra.mxu2 %v225_v12  ;;  %v157_v20 = vld [vmem:[#allocation5 + $0xa0] sm:$0xff] }
  0x20   :  { %v223_v17 = vld [vmem:[#allocation5 + $0x2b0] sm:$0xff]  ;;  %811 = vmatpush.msra.mxu1 %v193_v14  ;;  %v221_v21 = vld [vmem:[#allocation5 + $0x2a0] sm:$0xff]  ;;  %789 = vmatpush.msra.mxu0 %v159_v16 }
  0x21   :  { %v191_v18 = vld [vmem:[#allocation5 + $0x1b0] sm:$0xff]  ;;  %857 = vmatpush.msra.mxu3 %v257_v15  ;;  %835 = vmatpush.msra.mxu2 %v223_v17  ;;  %v189_v22 = vld [vmem:[#allocation5 + $0x1a0] sm:$0xff] }
  0x22   :  { %v255_v19 = vld [vmem:[#allocation5 + $0x3b0] sm:$0xff]  ;;  %v253_v23 = vld [vmem:[#allocation5 + $0x3a0] sm:$0xff]  ;;  %812 = vmatpush.msra.mxu1 %v191_v18  ;;  %790 = vmatpush.msra.mxu0 %v157_v20 }
  0x23   :  { %858 = vmatpush.msra.mxu3 %v255_v19  ;;  %v155_v24 = vld [vmem:[#allocation5 + $0x90] sm:$0xff]  ;;  %836 = vmatpush.msra.mxu2 %v221_v21  ;;  %v153_v28 = vld [vmem:[#allocation5 + $0x80] sm:$0xff] }
  0x24   :  { %v219_v25 = vld [vmem:[#allocation5 + $0x290] sm:$0xff]  ;;  %813 = vmatpush.msra.mxu1 %v189_v22  ;;  %v217_v29 = vld [vmem:[#allocation5 + $0x280] sm:$0xff]  ;;  %791 = vmatpush.msra.mxu0 %v155_v24 }
  0x25   :  { %v187_v26 = vld [vmem:[#allocation5 + $0x190] sm:$0xff]  ;;  %859 = vmatpush.msra.mxu3 %v253_v23  ;;  %837 = vmatpush.msra.mxu2 %v219_v25  ;;  %v185_v30 = vld [vmem:[#allocation5 + $0x180] sm:$0xff] }
  0x26   :  { %v251_v27 = vld [vmem:[#allocation5 + $0x390] sm:$0xff]  ;;  %v249_v31 = vld [vmem:[#allocation5 + $0x380] sm:$0xff]  ;;  %814 = vmatpush.msra.mxu1 %v187_v26  ;;  %792 = vmatpush.msra.mxu0 %v153_v28 }
  0x27   :  { %860 = vmatpush.msra.mxu3 %v251_v27  ;;  %v151_v32 = vld [vmem:[#allocation5 + $0x70] sm:$0xff]  ;;  %838 = vmatpush.msra.mxu2 %v217_v29  ;;  %v149_v36 = vld [vmem:[#allocation5 + $0x60] sm:$0xff] }
  0x28   :  { %v215_v33 = vld [vmem:[#allocation5 + $0x270] sm:$0xff]  ;;  %815 = vmatpush.msra.mxu1 %v185_v30  ;;  %v213_v37 = vld [vmem:[#allocation5 + $0x260] sm:$0xff]  ;;  %793 = vmatpush.msra.mxu0 %v151_v32 }
  0x29   :  { %v183_v34 = vld [vmem:[#allocation5 + $0x170] sm:$0xff]  ;;  %861 = vmatpush.msra.mxu3 %v249_v31  ;;  %839 = vmatpush.msra.mxu2 %v215_v33  ;;  %v181_v38 = vld [vmem:[#allocation5 + $0x160] sm:$0xff] }
  0x2a   :  { %v247_v35 = vld [vmem:[#allocation5 + $0x370] sm:$0xff]  ;;  %v245_v39 = vld [vmem:[#allocation5 + $0x360] sm:$0xff]  ;;  %816 = vmatpush.msra.mxu1 %v183_v34  ;;  %794 = vmatpush.msra.mxu0 %v149_v36 }
  0x2b   :  { %862 = vmatpush.msra.mxu3 %v247_v35  ;;  %v147_v40 = vld [vmem:[#allocation5 + $0x50] sm:$0xff]  ;;  %840 = vmatpush.msra.mxu2 %v213_v37  ;;  %v145_v44 = vld [vmem:[#allocation5 + $0x40] sm:$0xff] }
  0x2c   :  { %v211_v41 = vld [vmem:[#allocation5 + $0x250] sm:$0xff]  ;;  %817 = vmatpush.msra.mxu1 %v181_v38  ;;  %v209_v45 = vld [vmem:[#allocation5 + $0x240] sm:$0xff]  ;;  %795 = vmatpush.msra.mxu0 %v147_v40 }
  0x2d   :  { %v179_v42 = vld [vmem:[#allocation5 + $0x150] sm:$0xff]  ;;  %863 = vmatpush.msra.mxu3 %v245_v39  ;;  %841 = vmatpush.msra.mxu2 %v211_v41  ;;  %v177_v46 = vld [vmem:[#allocation5 + $0x140] sm:$0xff] }
  0x2e   :  { %v243_v43 = vld [vmem:[#allocation5 + $0x350] sm:$0xff]  ;;  %v241_v47 = vld [vmem:[#allocation5 + $0x340] sm:$0xff]  ;;  %818 = vmatpush.msra.mxu1 %v179_v42  ;;  %796 = vmatpush.msra.mxu0 %v145_v44 }
  0x2f   :  { %864 = vmatpush.msra.mxu3 %v243_v43  ;;  %v143_v48 = vld [vmem:[#allocation5 + $0x30] sm:$0xff]  ;;  %842 = vmatpush.msra.mxu2 %v209_v45  ;;  %v141_v52 = vld [vmem:[#allocation5 + $0x20] sm:$0xff] }
  0x30   :  { %v207_v49 = vld [vmem:[#allocation5 + $0x230] sm:$0xff]  ;;  %819 = vmatpush.msra.mxu1 %v177_v46  ;;  %v205_v53 = vld [vmem:[#allocation5 + $0x220] sm:$0xff]  ;;  %797 = vmatpush.msra.mxu0 %v143_v48 }
  0x31   :  { %v175_v50 = vld [vmem:[#allocation5 + $0x130] sm:$0xff]  ;;  %865 = vmatpush.msra.mxu3 %v241_v47  ;;  %843 = vmatpush.msra.mxu2 %v207_v49  ;;  %v173_v54 = vld [vmem:[#allocation5 + $0x120] sm:$0xff] }
  0x32   :  { %v239_v51 = vld [vmem:[#allocation5 + $0x330] sm:$0xff]  ;;  %v237_v55 = vld [vmem:[#allocation5 + $0x320] sm:$0xff]  ;;  %820 = vmatpush.msra.mxu1 %v175_v50  ;;  %798 = vmatpush.msra.mxu0 %v141_v52  ;;  %v100_v52 = vld [vmem:[#allocation2 + $0x18] sm:$0xff] }
  0x33   :  { %866 = vmatpush.msra.mxu3 %v239_v51  ;;  %v139_v56 = vld [vmem:[#allocation5 + $0x10] sm:$0xff]  ;;  %844 = vmatpush.msra.mxu2 %v205_v53  ;;  %v137_v60 = vld [vmem:[#allocation5] sm:$0xff] }
  0x34   :  { %v203_v57 = vld [vmem:[#allocation5 + $0x210] sm:$0xff]  ;;  %821 = vmatpush.msra.mxu1 %v173_v54  ;;  %v201_v61 = vld [vmem:[#allocation5 + $0x200] sm:$0xff]  ;;  %799 = vmatpush.msra.mxu0 %v139_v56 }
  0x35   :  { %v171_v58 = vld [vmem:[#allocation5 + $0x110] sm:$0xff]  ;;  %867 = vmatpush.msra.mxu3 %v237_v55  ;;  %845 = vmatpush.msra.mxu2 %v203_v57  ;;  %v169_v0 = vld [vmem:[#allocation5 + $0x100] sm:$0xff]  ;;  %v98_v57 = vld [vmem:[#allocation2 + $0x8] sm:$0xff] }
  0x36   :  { %v235_v59 = vld [vmem:[#allocation5 + $0x310] sm:$0xff]  ;;  %822 = vmatpush.msra.mxu1 %v171_v58  ;;  %v233_v1 = vld [vmem:[#allocation5 + $0x300] sm:$0xff]  ;;  %800 = vmatpush.msra.mxu0 %v137_v60 }
  0x37   :  { %v295_v62 = vld [vmem:[#allocation5 + $0x4f0] sm:$0xff]  ;;  %868 = vmatpush.msra.mxu3 %v235_v59  ;;  %846 = vmatpush.msra.mxu2 %v201_v61  ;;  %v293_v2 = vld [vmem:[#allocation5 + $0x4e0] sm:$0xff] }
  0x38   :  { %v359_v63 = vld [vmem:[#allocation5 + $0x6f0] sm:$0xff]  ;;  %877 = vmatpush.msrb.mxu0 %v295_v62  ;;  %v357_v4 = vld [vmem:[#allocation5 + $0x6e0] sm:$0xff]  ;;  %823 = vmatpush.msra.mxu1 %v169_v0 }
  0x39   :  { %v327_v3 = vld [vmem:[#allocation5 + $0x5f0] sm:$0xff]  ;;  %923 = vmatpush.msrb.mxu2 %v359_v63  ;;  %869 = vmatpush.msra.mxu3 %v233_v1  ;;  %v325_v7 = vld [vmem:[#allocation5 + $0x5e0] sm:$0xff] }
  0x3a   :  { %v391_v5 = vld [vmem:[#allocation5 + $0x7f0] sm:$0xff]  ;;  %878 = vmatpush.msrb.mxu0 %v293_v2  ;;  %900 = vmatpush.msrb.mxu1 %v327_v3  ;;  %v389_v9 = vld [vmem:[#allocation5 + $0x7e0] sm:$0xff] }
  0x3b   :  { %v291_v6 = vld [vmem:[#allocation5 + $0x4d0] sm:$0xff]  ;;  %924 = vmatpush.msrb.mxu2 %v357_v4  ;;  %946 = vmatpush.msrb.mxu3 %v391_v5  ;;  %v289_v10 = vld [vmem:[#allocation5 + $0x4c0] sm:$0xff] }
  0x3c   :  { %v355_v8 = vld [vmem:[#allocation5 + $0x6d0] sm:$0xff]  ;;  %879 = vmatpush.msrb.mxu0 %v291_v6  ;;  %901 = vmatpush.msrb.mxu1 %v325_v7  ;;  %v353_v12 = vld [vmem:[#allocation5 + $0x6c0] sm:$0xff] }
  0x3d   :  { %v323_v11 = vld [vmem:[#allocation5 + $0x5d0] sm:$0xff]  ;;  %925 = vmatpush.msrb.mxu2 %v355_v8  ;;  %947 = vmatpush.msrb.mxu3 %v389_v9  ;;  %v321_v15 = vld [vmem:[#allocation5 + $0x5c0] sm:$0xff]  ;;  %v120_v8 = vld [vmem:[#allocation2 + $0xb8] sm:$0xff] }
  0x3e   :  { %v387_v13 = vld [vmem:[#allocation5 + $0x7d0] sm:$0xff]  ;;  %880 = vmatpush.msrb.mxu0 %v289_v10  ;;  %902 = vmatpush.msrb.mxu1 %v323_v11  ;;  %v385_v17 = vld [vmem:[#allocation5 + $0x7c0] sm:$0xff] }
  0x3f   :  { %v287_v14 = vld [vmem:[#allocation5 + $0x4b0] sm:$0xff]  ;;  %926 = vmatpush.msrb.mxu2 %v353_v12  ;;  %948 = vmatpush.msrb.mxu3 %v387_v13  ;;  %v285_v18 = vld [vmem:[#allocation5 + $0x4a0] sm:$0xff]  ;;  %v118_v13 = vld [vmem:[#allocation2 + $0xa8] sm:$0xff] }
  0x40   :  { %v351_v16 = vld [vmem:[#allocation5 + $0x6b0] sm:$0xff]  ;;  %881 = vmatpush.msrb.mxu0 %v287_v14  ;;  %903 = vmatpush.msrb.mxu1 %v321_v15  ;;  %v349_v20 = vld [vmem:[#allocation5 + $0x6a0] sm:$0xff] }
  0x41   :  { %v319_v19 = vld [vmem:[#allocation5 + $0x5b0] sm:$0xff]  ;;  %927 = vmatpush.msrb.mxu2 %v351_v16  ;;  %949 = vmatpush.msrb.mxu3 %v385_v17  ;;  %v317_v23 = vld [vmem:[#allocation5 + $0x5a0] sm:$0xff] }
  0x42   :  { %v383_v21 = vld [vmem:[#allocation5 + $0x7b0] sm:$0xff]  ;;  %882 = vmatpush.msrb.mxu0 %v285_v18  ;;  %904 = vmatpush.msrb.mxu1 %v319_v19  ;;  %v381_v25 = vld [vmem:[#allocation5 + $0x7a0] sm:$0xff] }
  0x43   :  { %v283_v22 = vld [vmem:[#allocation5 + $0x490] sm:$0xff]  ;;  %928 = vmatpush.msrb.mxu2 %v349_v20  ;;  %950 = vmatpush.msrb.mxu3 %v383_v21  ;;  %v281_v26 = vld [vmem:[#allocation5 + $0x480] sm:$0xff] }
  0x44   :  { %v347_v24 = vld [vmem:[#allocation5 + $0x690] sm:$0xff]  ;;  %883 = vmatpush.msrb.mxu0 %v283_v22  ;;  %905 = vmatpush.msrb.mxu1 %v317_v23  ;;  %v345_v28 = vld [vmem:[#allocation5 + $0x680] sm:$0xff] }
  0x45   :  { %v315_v27 = vld [vmem:[#allocation5 + $0x590] sm:$0xff]  ;;  %929 = vmatpush.msrb.mxu2 %v347_v24  ;;  %951 = vmatpush.msrb.mxu3 %v381_v25  ;;  %v313_v31 = vld [vmem:[#allocation5 + $0x580] sm:$0xff] }
  0x46   :  { %v379_v29 = vld [vmem:[#allocation5 + $0x790] sm:$0xff]  ;;  %884 = vmatpush.msrb.mxu0 %v281_v26  ;;  %906 = vmatpush.msrb.mxu1 %v315_v27  ;;  %v377_v33 = vld [vmem:[#allocation5 + $0x780] sm:$0xff] }
  0x47   :  { %v279_v30 = vld [vmem:[#allocation5 + $0x470] sm:$0xff]  ;;  %930 = vmatpush.msrb.mxu2 %v345_v28  ;;  %952 = vmatpush.msrb.mxu3 %v379_v29  ;;  %v277_v34 = vld [vmem:[#allocation5 + $0x460] sm:$0xff]  ;;  %v104_v28 = vld [vmem:[#allocation2 + $0x38] sm:$0xff] }
  0x48   :  { %v343_v32 = vld [vmem:[#allocation5 + $0x670] sm:$0xff]  ;;  %885 = vmatpush.msrb.mxu0 %v279_v30  ;;  %907 = vmatpush.msrb.mxu1 %v313_v31  ;;  %v341_v36 = vld [vmem:[#allocation5 + $0x660] sm:$0xff] }
  0x49   :  { %v311_v35 = vld [vmem:[#allocation5 + $0x570] sm:$0xff]  ;;  %931 = vmatpush.msrb.mxu2 %v343_v32  ;;  %953 = vmatpush.msrb.mxu3 %v377_v33  ;;  %v309_v39 = vld [vmem:[#allocation5 + $0x560] sm:$0xff]  ;;  %v102_v33 = vld [vmem:[#allocation2 + $0x28] sm:$0xff] }
  0x4a   :  { %v375_v37 = vld [vmem:[#allocation5 + $0x770] sm:$0xff]  ;;  %886 = vmatpush.msrb.mxu0 %v277_v34  ;;  %908 = vmatpush.msrb.mxu1 %v311_v35  ;;  %v373_v41 = vld [vmem:[#allocation5 + $0x760] sm:$0xff] }
  0x4b   :  { %v275_v38 = vld [vmem:[#allocation5 + $0x450] sm:$0xff]  ;;  %932 = vmatpush.msrb.mxu2 %v341_v36  ;;  %954 = vmatpush.msrb.mxu3 %v375_v37  ;;  %v273_v42 = vld [vmem:[#allocation5 + $0x440] sm:$0xff] }
  0x4c   :  { %v339_v40 = vld [vmem:[#allocation5 + $0x650] sm:$0xff]  ;;  %887 = vmatpush.msrb.mxu0 %v275_v38  ;;  %909 = vmatpush.msrb.mxu1 %v309_v39  ;;  %v337_v44 = vld [vmem:[#allocation5 + $0x640] sm:$0xff] }
  0x4d   :  { %v307_v43 = vld [vmem:[#allocation5 + $0x550] sm:$0xff]  ;;  %933 = vmatpush.msrb.mxu2 %v339_v40  ;;  %955 = vmatpush.msrb.mxu3 %v373_v41  ;;  %v305_v48 = vld [vmem:[#allocation5 + $0x540] sm:$0xff] }
  0x4e   :  { %v371_v45 = vld [vmem:[#allocation5 + $0x750] sm:$0xff]  ;;  %888 = vmatpush.msrb.mxu0 %v273_v42  ;;  %910 = vmatpush.msrb.mxu1 %v307_v43  ;;  %v369_v50 = vld [vmem:[#allocation5 + $0x740] sm:$0xff] }
  0x4f   :  { %v99_v46 = vld [vmem:[#allocation2 + $0x10] sm:$0xff]  ;;  %934 = vmatpush.msrb.mxu2 %v337_v44  ;;  %956 = vmatpush.msrb.mxu3 %v371_v45  ;;  %v97_v51 = vld [vmem:[#allocation2] sm:$0xff] }
  0x50   :  { %v271_v47 = vld [vmem:[#allocation5 + $0x430] sm:$0xff]  ;;  %847 = vmatmul.f32.vlgmr.msra.gmra.mxu2 %v99_v46  ;;  %v269_v53 = vld [vmem:[#allocation5 + $0x420] sm:$0xff]  ;;  %911 = vmatpush.msrb.mxu1 %v305_v48 }
  0x51   :  { %v335_v49 = vld [vmem:[#allocation5 + $0x630] sm:$0xff]  ;;  %889 = vmatpush.msrb.mxu0 %v271_v47  ;;  %v333_v55 = vld [vmem:[#allocation5 + $0x620] sm:$0xff]  ;;  %957 = vmatpush.msrb.mxu3 %v369_v50 }
  0x52   :  { %935 = vmatpush.msrb.mxu2 %v335_v49  ;;  %v303_v54 = vld [vmem:[#allocation5 + $0x530] sm:$0xff]  ;;  %801 = vmatmul.f32.vlgmr.msra.gmra.mxu0 %v97_v51  ;;  %v301_v59 = vld [vmem:[#allocation5 + $0x520] sm:$0xff] }
  0x53   :  { %v367_v56 = vld [vmem:[#allocation5 + $0x730] sm:$0xff]  ;;  %870 = vmatmul.f32.vlgmr.msra.gmra.mxu3 %v100_v52  ;;  %890 = vmatpush.msrb.mxu0 %v269_v53  ;;  %v365_v61 = vld [vmem:[#allocation5 + $0x720] sm:$0xff] }
  0x54   :  { %v267_v58 = vld [vmem:[#allocation5 + $0x410] sm:$0xff]  ;;  %912 = vmatpush.msrb.mxu1 %v303_v54  ;;  %936 = vmatpush.msrb.mxu2 %v333_v55  ;;  %v265_v62 = vld [vmem:[#allocation5 + $0x400] sm:$0xff] }
  0x55   :  { %v331_v60 = vld [vmem:[#allocation5 + $0x610] sm:$0xff]  ;;  %958 = vmatpush.msrb.mxu3 %v367_v56  ;;  %824 = vmatmul.f32.vlgmr.msra.gmra.mxu1 %v98_v57  ;;  %v329_v0 = vld [vmem:[#allocation5 + $0x600] sm:$0xff] }
  0x56   :  { %v299_v63 = vld [vmem:[#allocation5 + $0x510] sm:$0xff]  ;;  %891 = vmatpush.msrb.mxu0 %v267_v58  ;;  %913 = vmatpush.msrb.mxu1 %v301_v59  ;;  %v297_v5 = vld [vmem:[#allocation5 + $0x500] sm:$0xff] }
  0x57   :  { %v363_v1 = vld [vmem:[#allocation5 + $0x710] sm:$0xff]  ;;  %937 = vmatpush.msrb.mxu2 %v331_v60  ;;  %959 = vmatpush.msrb.mxu3 %v365_v61  ;;  %v361_v6 = vld [vmem:[#allocation5 + $0x700] sm:$0xff] }
  0x58   :  { %v119_v2 = vld [vmem:[#allocation2 + $0xb0] sm:$0xff]  ;;  %892 = vmatpush.msrb.mxu0 %v265_v62  ;;  %914 = vmatpush.msrb.mxu1 %v299_v63  ;;  %v117_v7 = vld [vmem:[#allocation2 + $0xa0] sm:$0xff] }
  0x59   :  { %v423_v3 = vld [vmem:[#allocation5 + $0x8f0] sm:$0xff]  ;;  %938 = vmatpush.msrb.mxu2 %v329_v0  ;;  %960 = vmatpush.msrb.mxu3 %v363_v1  ;;  %v421_v9 = vld [vmem:[#allocation5 + $0x8e0] sm:$0xff]  ;;  %v122_v0 = vld [vmem:[#allocation2 + $0xc8] sm:$0xff] }
  0x5a   :  { %v487_v4 = vld [vmem:[#allocation5 + $0xaf0] sm:$0xff]  ;;  %850 = vmatmul.f32.gmra.mxu2 %v119_v2  ;;  %969 = vmatpush.msra.mxu0 %v423_v3  ;;  %v485_v11 = vld [vmem:[#allocation5 + $0xae0] sm:$0xff]  ;;  %v124_v1 = vld [vmem:[#allocation2 + $0xd8] sm:$0xff] }
  0x5b   :  { %1015 = vmatpush.msra.mxu2 %v487_v4  ;;  %915 = vmatpush.msrb.mxu1 %v297_v5  ;;  %v455_v10 = vld [vmem:[#allocation5 + $0x9f0] sm:$0xff]  ;;  %v453_v15 = vld [vmem:[#allocation5 + $0x9e0] sm:$0xff] }
  0x5c   :  { %961 = vmatpush.msrb.mxu3 %v361_v6  ;;  %804 = vmatmul.f32.gmra.mxu0 %v117_v7  ;;  %v519_v12 = vld [vmem:[#allocation5 + $0xbf0] sm:$0xff]  ;;  %v517_v17 = vld [vmem:[#allocation5 + $0xbe0] sm:$0xff] }
  0x5d   :  { %873 = vmatmul.f32.gmra.mxu3 %v120_v8  ;;  %970 = vmatpush.msra.mxu0 %v421_v9  ;;  %v419_v14 = vld [vmem:[#allocation5 + $0x8d0] sm:$0xff]  ;;  %v417_v18 = vld [vmem:[#allocation5 + $0x8c0] sm:$0xff] }
  0x5e   :  { %992 = vmatpush.msra.mxu1 %v455_v10  ;;  %1016 = vmatpush.msra.mxu2 %v485_v11  ;;  %v483_v16 = vld [vmem:[#allocation5 + $0xad0] sm:$0xff]  ;;  %v481_v20 = vld [vmem:[#allocation5 + $0xac0] sm:$0xff] }
  0x5f   :  { %1038 = vmatpush.msra.mxu3 %v519_v12  ;;  %827 = vmatmul.f32.gmra.mxu1 %v118_v13  ;;  %v451_v19 = vld [vmem:[#allocation5 + $0x9d0] sm:$0xff]  ;;  %v449_v24 = vld [vmem:[#allocation5 + $0x9c0] sm:$0xff] }
  0x60   :  { %971 = vmatpush.msra.mxu0 %v419_v14  ;;  %993 = vmatpush.msra.mxu1 %v453_v15  ;;  %v515_v21 = vld [vmem:[#allocation5 + $0xbd0] sm:$0xff]  ;;  %v513_v26 = vld [vmem:[#allocation5 + $0xbc0] sm:$0xff] }
  0x61   :  { %1017 = vmatpush.msra.mxu2 %v483_v16  ;;  %1039 = vmatpush.msra.mxu3 %v517_v17  ;;  %v103_v22 = vld [vmem:[#allocation2 + $0x30] sm:$0xff]  ;;  %v101_v27 = vld [vmem:[#allocation2 + $0x20] sm:$0xff] }
  0x62   :  { %v415_v23 = vld [vmem:[#allocation5 + $0x8b0] sm:$0xff]  ;;  %972 = vmatpush.msra.mxu0 %v417_v18  ;;  %994 = vmatpush.msra.mxu1 %v451_v19  ;;  %v413_v29 = vld [vmem:[#allocation5 + $0x8a0] sm:$0xff] }
  0x63   :  { %v479_v25 = vld [vmem:[#allocation5 + $0xab0] sm:$0xff]  ;;  %1018 = vmatpush.msra.mxu2 %v481_v20  ;;  %1040 = vmatpush.msra.mxu3 %v515_v21  ;;  %v477_v31 = vld [vmem:[#allocation5 + $0xaa0] sm:$0xff]  ;;  %v106_v20 = vld [vmem:[#allocation2 + $0x48] sm:$0xff] }
  0x64   :  { %939 = vmatmul.f32.vlgmr.msrb.gmra.mxu2 %v103_v22  ;;  %973 = vmatpush.msra.mxu0 %v415_v23  ;;  %v447_v30 = vld [vmem:[#allocation5 + $0x9b0] sm:$0xff]  ;;  %v445_v35 = vld [vmem:[#allocation5 + $0x9a0] sm:$0xff]  ;;  %v108_v21 = vld [vmem:[#allocation2 + $0x58] sm:$0xff] }
  0x65   :  { %995 = vmatpush.msra.mxu1 %v449_v24  ;;  %1019 = vmatpush.msra.mxu2 %v479_v25  ;;  %v511_v32 = vld [vmem:[#allocation5 + $0xbb0] sm:$0xff]  ;;  %v509_v37 = vld [vmem:[#allocation5 + $0xba0] sm:$0xff] }
  0x66   :  { %1041 = vmatpush.msra.mxu3 %v513_v26  ;;  %893 = vmatmul.f32.vlgmr.msrb.gmra.mxu0 %v101_v27  ;;  %v411_v34 = vld [vmem:[#allocation5 + $0x890] sm:$0xff]  ;;  %v409_v38 = vld [vmem:[#allocation5 + $0x880] sm:$0xff] }
  0x67   :  { %962 = vmatmul.f32.vlgmr.msrb.gmra.mxu3 %v104_v28  ;;  %974 = vmatpush.msra.mxu0 %v413_v29  ;;  %v475_v36 = vld [vmem:[#allocation5 + $0xa90] sm:$0xff]  ;;  %v473_v40 = vld [vmem:[#allocation5 + $0xa80] sm:$0xff] }
  0x68   :  { %996 = vmatpush.msra.mxu1 %v447_v30  ;;  %1020 = vmatpush.msra.mxu2 %v477_v31  ;;  %v443_v39 = vld [vmem:[#allocation5 + $0x990] sm:$0xff]  ;;  %v441_v43 = vld [vmem:[#allocation5 + $0x980] sm:$0xff] }
  0x69   :  { %1042 = vmatpush.msra.mxu3 %v511_v32  ;;  %916 = vmatmul.f32.vlgmr.msrb.gmra.mxu1 %v102_v33  ;;  %v507_v41 = vld [vmem:[#allocation5 + $0xb90] sm:$0xff]  ;;  %v505_v45 = vld [vmem:[#allocation5 + $0xb80] sm:$0xff] }
  0x6a   :  { %975 = vmatpush.msra.mxu0 %v411_v34  ;;  %997 = vmatpush.msra.mxu1 %v445_v35  ;;  %v407_v42 = vld [vmem:[#allocation5 + $0x870] sm:$0xff]  ;;  %v405_v46 = vld [vmem:[#allocation5 + $0x860] sm:$0xff] }
  0x6b   :  { %1021 = vmatpush.msra.mxu2 %v475_v36  ;;  %1043 = vmatpush.msra.mxu3 %v509_v37  ;;  %v471_v44 = vld [vmem:[#allocation5 + $0xa70] sm:$0xff]  ;;  %v469_v48 = vld [vmem:[#allocation5 + $0xa60] sm:$0xff] }
  0x6c   :  { %976 = vmatpush.msra.mxu0 %v409_v38  ;;  %998 = vmatpush.msra.mxu1 %v443_v39  ;;  %v439_v47 = vld [vmem:[#allocation5 + $0x970] sm:$0xff]  ;;  %v437_v51 = vld [vmem:[#allocation5 + $0x960] sm:$0xff] }
  0x6d   :  { %1022 = vmatpush.msra.mxu2 %v473_v40  ;;  %1044 = vmatpush.msra.mxu3 %v507_v41  ;;  %v503_v49 = vld [vmem:[#allocation5 + $0xb70] sm:$0xff]  ;;  %v501_v53 = vld [vmem:[#allocation5 + $0xb60] sm:$0xff]  ;;  %v128_v40 = vld [vmem:[#allocation2 + $0xf8] sm:$0xff] }
  0x6e   :  { %977 = vmatpush.msra.mxu0 %v407_v42  ;;  %999 = vmatpush.msra.mxu1 %v441_v43  ;;  %v403_v50 = vld [vmem:[#allocation5 + $0x850] sm:$0xff]  ;;  %v401_v54 = vld [vmem:[#allocation5 + $0x840] sm:$0xff] }
  0x6f   :  { %1023 = vmatpush.msra.mxu2 %v471_v44  ;;  %1045 = vmatpush.msra.mxu3 %v505_v45  ;;  %v467_v52 = vld [vmem:[#allocation5 + $0xa50] sm:$0xff]  ;;  %v465_v56 = vld [vmem:[#allocation5 + $0xa40] sm:$0xff]  ;;  %v126_v45 = vld [vmem:[#allocation2 + $0xe8] sm:$0xff] }
  0x70   :  { %978 = vmatpush.msra.mxu0 %v405_v46  ;;  %1000 = vmatpush.msra.mxu1 %v439_v47  ;;  %v435_v55 = vld [vmem:[#allocation5 + $0x950] sm:$0xff]  ;;  %v121_v58 = vld [vmem:[#allocation2 + $0xc0] sm:$0xff] }
  0x71   :  { %1024 = vmatpush.msra.mxu2 %v469_v48  ;;  %1046 = vmatpush.msra.mxu3 %v503_v49  ;;  %v499_v57 = vld [vmem:[#allocation5 + $0xb50] sm:$0xff]  ;;  %v433_v61 = vld [vmem:[#allocation5 + $0x940] sm:$0xff] }
  0x72   :  { %979 = vmatpush.msra.mxu0 %v403_v50  ;;  %1001 = vmatpush.msra.mxu1 %v437_v51  ;;  %v123_v59 = vld [vmem:[#allocation2 + $0xd0] sm:$0xff]  ;;  %v497_v63 = vld [vmem:[#allocation5 + $0xb40] sm:$0xff] }
  0x73   :  { %1025 = vmatpush.msra.mxu2 %v467_v52  ;;  %1047 = vmatpush.msra.mxu3 %v501_v53  ;;  %v399_v60 = vld [vmem:[#allocation5 + $0x830] sm:$0xff]  ;;  %v397_v2 = vld [vmem:[#allocation5 + $0x820] sm:$0xff] }
  0x74   :  { %980 = vmatpush.msra.mxu0 %v401_v54  ;;  %1002 = vmatpush.msra.mxu1 %v435_v55  ;;  %v463_v62 = vld [vmem:[#allocation5 + $0xa30] sm:$0xff]  ;;  %v461_v4 = vld [vmem:[#allocation5 + $0xa20] sm:$0xff] }
  0x75   :  { %1026 = vmatpush.msra.mxu2 %v465_v56  ;;  %1048 = vmatpush.msra.mxu3 %v499_v57  ;;  %v431_v3 = vld [vmem:[#allocation5 + $0x930] sm:$0xff]  ;;  %v429_v7 = vld [vmem:[#allocation5 + $0x920] sm:$0xff] }
  0x76   :  { %896 = vmatmul.f32.gmra.mxu0 %v121_v58  ;;  %942 = vmatmul.f32.gmra.mxu2 %v123_v59  ;;  %v495_v5 = vld [vmem:[#allocation5 + $0xb30] sm:$0xff]  ;;  %v493_v9 = vld [vmem:[#allocation5 + $0xb20] sm:$0xff] }
  0x77   :  { %981 = vmatpush.msra.mxu0 %v399_v60  ;;  %1003 = vmatpush.msra.mxu1 %v433_v61  ;;  %v395_v6 = vld [vmem:[#allocation5 + $0x810] sm:$0xff]  ;;  %v393_v10 = vld [vmem:[#allocation5 + $0x800] sm:$0xff] }
  0x78   :  { %1027 = vmatpush.msra.mxu2 %v463_v62  ;;  %1049 = vmatpush.msra.mxu3 %v497_v63  ;;  %v459_v8 = vld [vmem:[#allocation5 + $0xa10] sm:$0xff]  ;;  %v457_v12 = vld [vmem:[#allocation5 + $0xa00] sm:$0xff] }
  0x79   :  { %919 = vmatmul.f32.gmra.mxu1 %v122_v0  ;;  %965 = vmatmul.f32.gmra.mxu3 %v124_v1  ;;  %v427_v11 = vld [vmem:[#allocation5 + $0x910] sm:$0xff]  ;;  %v105_v14 = vld [vmem:[#allocation2 + $0x40] sm:$0xff] }
  0x7a   :  { %982 = vmatpush.msra.mxu0 %v397_v2  ;;  %1004 = vmatpush.msra.mxu1 %v431_v3  ;;  %v491_v13 = vld [vmem:[#allocation5 + $0xb10] sm:$0xff]  ;;  %v425_v18 = vld [vmem:[#allocation5 + $0x900] sm:$0xff] }
  0x7b   :  { %1028 = vmatpush.msra.mxu2 %v461_v4  ;;  %1050 = vmatpush.msra.mxu3 %v495_v5  ;;  %v107_v15 = vld [vmem:[#allocation2 + $0x50] sm:$0xff]  ;;  %v489_v19 = vld [vmem:[#allocation5 + $0xb00] sm:$0xff] }
  0x7c   :  { %983 = vmatpush.msra.mxu0 %v395_v6  ;;  %1005 = vmatpush.msra.mxu1 %v429_v7  ;;  %v551_v16 = vld [vmem:[#allocation5 + $0xcf0] sm:$0xff]  ;;  %v549_v22 = vld [vmem:[#allocation5 + $0xce0] sm:$0xff] }
  0x7d   :  { %1029 = vmatpush.msra.mxu2 %v459_v8  ;;  %1051 = vmatpush.msra.mxu3 %v493_v9  ;;  %v615_v17 = vld [vmem:[#allocation5 + $0xef0] sm:$0xff]  ;;  %v613_v24 = vld [vmem:[#allocation5 + $0xee0] sm:$0xff] }
  0x7e   :  { %984 = vmatpush.msra.mxu0 %v393_v10  ;;  %1006 = vmatpush.msra.mxu1 %v427_v11  ;;  %v583_v23 = vld [vmem:[#allocation5 + $0xdf0] sm:$0xff]  ;;  %v581_v27 = vld [vmem:[#allocation5 + $0xde0] sm:$0xff] }
  0x7f   :  { %1030 = vmatpush.msra.mxu2 %v457_v12  ;;  %1052 = vmatpush.msra.mxu3 %v491_v13  ;;  %v647_v25 = vld [vmem:[#allocation5 + $0xff0] sm:$0xff]  ;;  %v645_v29 = vld [vmem:[#allocation5 + $0xfe0] sm:$0xff] }
  0x80   :  { %985 = vmatmul.f32.vlgmr.msra.gmra.mxu0 %v105_v14  ;;  %1031 = vmatmul.f32.vlgmr.msra.gmra.mxu2 %v107_v15  ;;  %v547_v26 = vld [vmem:[#allocation5 + $0xcd0] sm:$0xff]  ;;  %v545_v30 = vld [vmem:[#allocation5 + $0xcc0] sm:$0xff] }
  0x81   :  { %1061 = vmatpush.msrb.mxu0 %v551_v16  ;;  %1107 = vmatpush.msrb.mxu2 %v615_v17  ;;  %v611_v28 = vld [vmem:[#allocation5 + $0xed0] sm:$0xff]  ;;  %v609_v32 = vld [vmem:[#allocation5 + $0xec0] sm:$0xff] }
  0x82   :  { %1007 = vmatpush.msra.mxu1 %v425_v18  ;;  %1053 = vmatpush.msra.mxu3 %v489_v19  ;;  %v579_v31 = vld [vmem:[#allocation5 + $0xdd0] sm:$0xff]  ;;  %v577_v36 = vld [vmem:[#allocation5 + $0xdc0] sm:$0xff] }
  0x83   :  { %1008 = vmatmul.f32.vlgmr.msra.gmra.mxu1 %v106_v20  ;;  %1054 = vmatmul.f32.vlgmr.msra.gmra.mxu3 %v108_v21  ;;  %v643_v33 = vld [vmem:[#allocation5 + $0xfd0] sm:$0xff]  ;;  %v641_v38 = vld [vmem:[#allocation5 + $0xfc0] sm:$0xff] }
  0x84   :  { %1062 = vmatpush.msrb.mxu0 %v549_v22  ;;  %1084 = vmatpush.msrb.mxu1 %v583_v23  ;;  %v127_v34 = vld [vmem:[#allocation2 + $0xf0] sm:$0xff]  ;;  %v125_v39 = vld [vmem:[#allocation2 + $0xe0] sm:$0xff] }
  0x85   :  { %1108 = vmatpush.msrb.mxu2 %v613_v24  ;;  %1130 = vmatpush.msrb.mxu3 %v647_v25  ;;  %v543_v35 = vld [vmem:[#allocation5 + $0xcb0] sm:$0xff]  ;;  %v541_v41 = vld [vmem:[#allocation5 + $0xca0] sm:$0xff] }
  0x86   :  { %1063 = vmatpush.msrb.mxu0 %v547_v26  ;;  %1085 = vmatpush.msrb.mxu1 %v581_v27  ;;  %v607_v37 = vld [vmem:[#allocation5 + $0xeb0] sm:$0xff]  ;;  %v605_v43 = vld [vmem:[#allocation5 + $0xea0] sm:$0xff] }
  0x87   :  { %1109 = vmatpush.msrb.mxu2 %v611_v28  ;;  %1131 = vmatpush.msrb.mxu3 %v645_v29  ;;  %v575_v42 = vld [vmem:[#allocation5 + $0xdb0] sm:$0xff]  ;;  %v573_v47 = vld [vmem:[#allocation5 + $0xda0] sm:$0xff]  ;;  %v110_v28 = vld [vmem:[#allocation2 + $0x68] sm:$0xff] }
  0x88   :  { %1064 = vmatpush.msrb.mxu0 %v545_v30  ;;  %1086 = vmatpush.msrb.mxu1 %v579_v31  ;;  %v639_v44 = vld [vmem:[#allocation5 + $0xfb0] sm:$0xff]  ;;  %v637_v49 = vld [vmem:[#allocation5 + $0xfa0] sm:$0xff]  ;;  %v112_v29 = vld [vmem:[#allocation2 + $0x78] sm:$0xff] }
  0x89   :  { %1110 = vmatpush.msrb.mxu2 %v609_v32  ;;  %1132 = vmatpush.msrb.mxu3 %v643_v33  ;;  %v539_v46 = vld [vmem:[#allocation5 + $0xc90] sm:$0xff]  ;;  %v537_v50 = vld [vmem:[#allocation5 + $0xc80] sm:$0xff] }
  0x8a   :  { %1034 = vmatmul.f32.gmra.mxu2 %v127_v34  ;;  %1065 = vmatpush.msrb.mxu0 %v543_v35  ;;  %v603_v48 = vld [vmem:[#allocation5 + $0xe90] sm:$0xff]  ;;  %v601_v52 = vld [vmem:[#allocation5 + $0xe80] sm:$0xff] }
  0x8b   :  { %1087 = vmatpush.msrb.mxu1 %v577_v36  ;;  %1111 = vmatpush.msrb.mxu2 %v607_v37  ;;  %v571_v51 = vld [vmem:[#allocation5 + $0xd90] sm:$0xff]  ;;  %v569_v55 = vld [vmem:[#allocation5 + $0xd80] sm:$0xff] }
  0x8c   :  { %1133 = vmatpush.msrb.mxu3 %v641_v38  ;;  %988 = vmatmul.f32.gmra.mxu0 %v125_v39  ;;  %v635_v53 = vld [vmem:[#allocation5 + $0xf90] sm:$0xff]  ;;  %v633_v57 = vld [vmem:[#allocation5 + $0xf80] sm:$0xff] }
  0x8d   :  { %1057 = vmatmul.f32.gmra.mxu3 %v128_v40  ;;  %1066 = vmatpush.msrb.mxu0 %v541_v41  ;;  %v535_v54 = vld [vmem:[#allocation5 + $0xc70] sm:$0xff]  ;;  %v533_v58 = vld [vmem:[#allocation5 + $0xc60] sm:$0xff] }
  0x8e   :  { %1088 = vmatpush.msrb.mxu1 %v575_v42  ;;  %1112 = vmatpush.msrb.mxu2 %v605_v43  ;;  %v599_v56 = vld [vmem:[#allocation5 + $0xe70] sm:$0xff]  ;;  %v597_v60 = vld [vmem:[#allocation5 + $0xe60] sm:$0xff] }
  0x8f   :  { %1134 = vmatpush.msrb.mxu3 %v639_v44  ;;  %1011 = vmatmul.f32.gmra.mxu1 %v126_v45  ;;  %v567_v59 = vld [vmem:[#allocation5 + $0xd70] sm:$0xff]  ;;  %v565_v63 = vld [vmem:[#allocation5 + $0xd60] sm:$0xff] }
  0x90   :  { %1067 = vmatpush.msrb.mxu0 %v539_v46  ;;  %1089 = vmatpush.msrb.mxu1 %v573_v47  ;;  %v631_v61 = vld [vmem:[#allocation5 + $0xf70] sm:$0xff]  ;;  %v629_v1 = vld [vmem:[#allocation5 + $0xf60] sm:$0xff] }
  0x91   :  { %1113 = vmatpush.msrb.mxu2 %v603_v48  ;;  %1135 = vmatpush.msrb.mxu3 %v637_v49  ;;  %v531_v62 = vld [vmem:[#allocation5 + $0xc50] sm:$0xff]  ;;  %v529_v2 = vld [vmem:[#allocation5 + $0xc40] sm:$0xff]  ;;  %v130_v48 = vld [vmem:[#allocation2 + $0x108] sm:$0xff] }
  0x92   :  { %1068 = vmatpush.msrb.mxu0 %v537_v50  ;;  %1090 = vmatpush.msrb.mxu1 %v571_v51  ;;  %v595_v0 = vld [vmem:[#allocation5 + $0xe50] sm:$0xff]  ;;  %v593_v4 = vld [vmem:[#allocation5 + $0xe40] sm:$0xff]  ;;  %v132_v49 = vld [vmem:[#allocation2 + $0x118] sm:$0xff] }
  0x93   :  { %1114 = vmatpush.msrb.mxu2 %v601_v52  ;;  %1136 = vmatpush.msrb.mxu3 %v635_v53  ;;  %v563_v3 = vld [vmem:[#allocation5 + $0xd50] sm:$0xff]  ;;  %v561_v7 = vld [vmem:[#allocation5 + $0xd40] sm:$0xff] }
  0x94   :  { %1069 = vmatpush.msrb.mxu0 %v535_v54  ;;  %1091 = vmatpush.msrb.mxu1 %v569_v55  ;;  %v627_v5 = vld [vmem:[#allocation5 + $0xf50] sm:$0xff]  ;;  %v625_v9 = vld [vmem:[#allocation5 + $0xf40] sm:$0xff] }
  0x95   :  { %1115 = vmatpush.msrb.mxu2 %v599_v56  ;;  %1137 = vmatpush.msrb.mxu3 %v633_v57  ;;  %v527_v6 = vld [vmem:[#allocation5 + $0xc30] sm:$0xff]  ;;  %v525_v10 = vld [vmem:[#allocation5 + $0xc20] sm:$0xff] }
  0x96   :  { %1070 = vmatpush.msrb.mxu0 %v533_v58  ;;  %1092 = vmatpush.msrb.mxu1 %v567_v59  ;;  %v591_v8 = vld [vmem:[#allocation5 + $0xe30] sm:$0xff]  ;;  %v589_v12 = vld [vmem:[#allocation5 + $0xe20] sm:$0xff] }
  0x97   :  { %1116 = vmatpush.msrb.mxu2 %v597_v60  ;;  %1138 = vmatpush.msrb.mxu3 %v631_v61  ;;  %v559_v11 = vld [vmem:[#allocation5 + $0xd30] sm:$0xff]  ;;  %v557_v15 = vld [vmem:[#allocation5 + $0xd20] sm:$0xff] }
  0x98   :  { %1071 = vmatpush.msrb.mxu0 %v531_v62  ;;  %1093 = vmatpush.msrb.mxu1 %v565_v63  ;;  %v623_v13 = vld [vmem:[#allocation5 + $0xf30] sm:$0xff]  ;;  %v621_v17 = vld [vmem:[#allocation5 + $0xf20] sm:$0xff] }
  0x99   :  { %1117 = vmatpush.msrb.mxu2 %v595_v0  ;;  %1139 = vmatpush.msrb.mxu3 %v629_v1  ;;  %v523_v14 = vld [vmem:[#allocation5 + $0xc10] sm:$0xff]  ;;  %v521_v18 = vld [vmem:[#allocation5 + $0xc00] sm:$0xff] }
  0x9a   :  { %1072 = vmatpush.msrb.mxu0 %v529_v2  ;;  %1094 = vmatpush.msrb.mxu1 %v563_v3  ;;  %v587_v16 = vld [vmem:[#allocation5 + $0xe10] sm:$0xff]  ;;  %v585_v20 = vld [vmem:[#allocation5 + $0xe00] sm:$0xff] }
  0x9b   :  { %1118 = vmatpush.msrb.mxu2 %v593_v4  ;;  %1140 = vmatpush.msrb.mxu3 %v627_v5  ;;  %v555_v19 = vld [vmem:[#allocation5 + $0xd10] sm:$0xff]  ;;  %v109_v22 = vld [vmem:[#allocation2 + $0x60] sm:$0xff] }
  0x9c   :  { %1073 = vmatpush.msrb.mxu0 %v527_v6  ;;  %1095 = vmatpush.msrb.mxu1 %v561_v7  ;;  %v619_v21 = vld [vmem:[#allocation5 + $0xf10] sm:$0xff]  ;;  %v553_v26 = vld [vmem:[#allocation5 + $0xd00] sm:$0xff] }
  0x9d   :  { %1119 = vmatpush.msrb.mxu2 %v591_v8  ;;  %1141 = vmatpush.msrb.mxu3 %v625_v9  ;;  %v111_v23 = vld [vmem:[#allocation2 + $0x70] sm:$0xff]  ;;  %v617_v27 = vld [vmem:[#allocation5 + $0xf00] sm:$0xff] }
  0x9e   :  { %1074 = vmatpush.msrb.mxu0 %v525_v10  ;;  %1096 = vmatpush.msrb.mxu1 %v559_v11  ;;  %v679_v24 = vld [vmem:[#allocation5 + $0x10f0] sm:$0xff]  ;;  %v677_v30 = vld [vmem:[#allocation5 + $0x10e0] sm:$0xff] }
  0x9f   :  { %1120 = vmatpush.msrb.mxu2 %v589_v12  ;;  %1142 = vmatpush.msrb.mxu3 %v623_v13  ;;  %v743_v25 = vld [vmem:[#allocation5 + $0x12f0] sm:$0xff]  ;;  %v741_v32 = vld [vmem:[#allocation5 + $0x12e0] sm:$0xff] }
  0xa0   :  { %1075 = vmatpush.msrb.mxu0 %v523_v14  ;;  %1097 = vmatpush.msrb.mxu1 %v557_v15  ;;  %v711_v31 = vld [vmem:[#allocation5 + $0x11f0] sm:$0xff]  ;;  %v709_v35 = vld [vmem:[#allocation5 + $0x11e0] sm:$0xff] }
  0xa1   :  { %1121 = vmatpush.msrb.mxu2 %v587_v16  ;;  %1143 = vmatpush.msrb.mxu3 %v621_v17  ;;  %v775_v33 = vld [vmem:[#allocation5 + $0x13f0] sm:$0xff]  ;;  %v773_v37 = vld [vmem:[#allocation5 + $0x13e0] sm:$0xff] }
  0xa2   :  { %1076 = vmatpush.msrb.mxu0 %v521_v18  ;;  %1098 = vmatpush.msrb.mxu1 %v555_v19  ;;  %v675_v34 = vld [vmem:[#allocation5 + $0x10d0] sm:$0xff]  ;;  %v673_v38 = vld [vmem:[#allocation5 + $0x10c0] sm:$0xff] }
  0xa3   :  { %1122 = vmatpush.msrb.mxu2 %v585_v20  ;;  %1144 = vmatpush.msrb.mxu3 %v619_v21  ;;  %v739_v36 = vld [vmem:[#allocation5 + $0x12d0] sm:$0xff]  ;;  %v737_v40 = vld [vmem:[#allocation5 + $0x12c0] sm:$0xff] }
  0xa4   :  { %1077 = vmatmul.f32.vlgmr.msrb.gmra.mxu0 %v109_v22  ;;  %1123 = vmatmul.f32.vlgmr.msrb.gmra.mxu2 %v111_v23  ;;  %v707_v39 = vld [vmem:[#allocation5 + $0x11d0] sm:$0xff]  ;;  %v129_v42 = vld [vmem:[#allocation2 + $0x100] sm:$0xff] }
  0xa5   :  { %1153 = vmatpush.msra.mxu0 %v679_v24  ;;  %1199 = vmatpush.msra.mxu2 %v743_v25  ;;  %v771_v41 = vld [vmem:[#allocation5 + $0x13d0] sm:$0xff]  ;;  %v705_v45 = vld [vmem:[#allocation5 + $0x11c0] sm:$0xff] }
  0xa6   :  { %1099 = vmatpush.msrb.mxu1 %v553_v26  ;;  %1145 = vmatpush.msrb.mxu3 %v617_v27  ;;  %v131_v43 = vld [vmem:[#allocation2 + $0x110] sm:$0xff]  ;;  %v769_v47 = vld [vmem:[#allocation5 + $0x13c0] sm:$0xff] }
  0xa7   :  { %1100 = vmatmul.f32.vlgmr.msrb.gmra.mxu1 %v110_v28  ;;  %1146 = vmatmul.f32.vlgmr.msrb.gmra.mxu3 %v112_v29  ;;  %v671_v44 = vld [vmem:[#allocation5 + $0x10b0] sm:$0xff]  ;;  %v669_v50 = vld [vmem:[#allocation5 + $0x10a0] sm:$0xff] }
  0xa8   :  { %1154 = vmatpush.msra.mxu0 %v677_v30  ;;  %1176 = vmatpush.msra.mxu1 %v711_v31  ;;  %v735_v46 = vld [vmem:[#allocation5 + $0x12b0] sm:$0xff]  ;;  %v733_v52 = vld [vmem:[#allocation5 + $0x12a0] sm:$0xff] }
  0xa9   :  { %1200 = vmatpush.msra.mxu2 %v741_v32  ;;  %1222 = vmatpush.msra.mxu3 %v775_v33  ;;  %v703_v51 = vld [vmem:[#allocation5 + $0x11b0] sm:$0xff]  ;;  %v701_v55 = vld [vmem:[#allocation5 + $0x11a0] sm:$0xff]  ;;  %v168_v32 = vld [vmem:[#allocation5 + $0xf8] sm:$0xff] }
  0xaa   :  { %1155 = vmatpush.msra.mxu0 %v675_v34  ;;  %1177 = vmatpush.msra.mxu1 %v709_v35  ;;  %v767_v53 = vld [vmem:[#allocation5 + $0x13b0] sm:$0xff]  ;;  %v765_v57 = vld [vmem:[#allocation5 + $0x13a0] sm:$0xff]  ;;  %v232_v33 = vld [vmem:[#allocation5 + $0x2f8] sm:$0xff] }
  0xab   :  { %1201 = vmatpush.msra.mxu2 %v739_v36  ;;  %1223 = vmatpush.msra.mxu3 %v773_v37  ;;  %v667_v54 = vld [vmem:[#allocation5 + $0x1090] sm:$0xff]  ;;  %v665_v58 = vld [vmem:[#allocation5 + $0x1080] sm:$0xff]  ;;  %v114_v36 = vld [vmem:[#allocation2 + $0x88] sm:$0xff] }
  0xac   :  { %1156 = vmatpush.msra.mxu0 %v673_v38  ;;  %1178 = vmatpush.msra.mxu1 %v707_v39  ;;  %v731_v56 = vld [vmem:[#allocation5 + $0x1290] sm:$0xff]  ;;  %v729_v60 = vld [vmem:[#allocation5 + $0x1280] sm:$0xff]  ;;  %v116_v37 = vld [vmem:[#allocation2 + $0x98] sm:$0xff] }
  0xad   :  { %1202 = vmatpush.msra.mxu2 %v737_v40  ;;  %1224 = vmatpush.msra.mxu3 %v771_v41  ;;  %v699_v59 = vld [vmem:[#allocation5 + $0x1190] sm:$0xff]  ;;  %v697_v63 = vld [vmem:[#allocation5 + $0x1180] sm:$0xff]  ;;  %v166_v38 = vld [vmem:[#allocation5 + $0xe8] sm:$0xff] }
  0xae   :  { %1080 = vmatmul.f32.gmra.mxu0 %v129_v42  ;;  %1126 = vmatmul.f32.gmra.mxu2 %v131_v43  ;;  %v763_v61 = vld [vmem:[#allocation5 + $0x1390] sm:$0xff]  ;;  %v761_v1 = vld [vmem:[#allocation5 + $0x1380] sm:$0xff]  ;;  %v200_v39 = vld [vmem:[#allocation5 + $0x1f8] sm:$0xff] }
  0xaf   :  { %1157 = vmatpush.msra.mxu0 %v671_v44  ;;  %1179 = vmatpush.msra.mxu1 %v705_v45  ;;  %v663_v62 = vld [vmem:[#allocation5 + $0x1070] sm:$0xff]  ;;  %v661_v2 = vld [vmem:[#allocation5 + $0x1060] sm:$0xff]  ;;  %v230_v40 = vld [vmem:[#allocation5 + $0x2e8] sm:$0xff] }
  0xb0   :  { %1203 = vmatpush.msra.mxu2 %v735_v46  ;;  %1225 = vmatpush.msra.mxu3 %v769_v47  ;;  %v727_v0 = vld [vmem:[#allocation5 + $0x1270] sm:$0xff]  ;;  %v725_v4 = vld [vmem:[#allocation5 + $0x1260] sm:$0xff]  ;;  %v264_v41 = vld [vmem:[#allocation5 + $0x3f8] sm:$0xff] }
  0xb1   :  { %1103 = vmatmul.f32.gmra.mxu1 %v130_v48  ;;  %1149 = vmatmul.f32.gmra.mxu3 %v132_v49  ;;  %v695_v3 = vld [vmem:[#allocation5 + $0x1170] sm:$0xff]  ;;  %v693_v7 = vld [vmem:[#allocation5 + $0x1160] sm:$0xff]  ;;  %v164_v42 = vld [vmem:[#allocation5 + $0xd8] sm:$0xff] }
  0xb2   :  { %1158 = vmatpush.msra.mxu0 %v669_v50  ;;  %1180 = vmatpush.msra.mxu1 %v703_v51  ;;  %v759_v5 = vld [vmem:[#allocation5 + $0x1370] sm:$0xff]  ;;  %v757_v9 = vld [vmem:[#allocation5 + $0x1360] sm:$0xff]  ;;  %v198_v43 = vld [vmem:[#allocation5 + $0x1e8] sm:$0xff] }
  0xb3   :  { %1204 = vmatpush.msra.mxu2 %v733_v52  ;;  %1226 = vmatpush.msra.mxu3 %v767_v53  ;;  %v659_v6 = vld [vmem:[#allocation5 + $0x1050] sm:$0xff]  ;;  %v657_v10 = vld [vmem:[#allocation5 + $0x1040] sm:$0xff]  ;;  %v228_v44 = vld [vmem:[#allocation5 + $0x2d8] sm:$0xff] }
  0xb4   :  { %1159 = vmatpush.msra.mxu0 %v667_v54  ;;  %1181 = vmatpush.msra.mxu1 %v701_v55  ;;  %v723_v8 = vld [vmem:[#allocation5 + $0x1250] sm:$0xff]  ;;  %v721_v12 = vld [vmem:[#allocation5 + $0x1240] sm:$0xff]  ;;  %v262_v45 = vld [vmem:[#allocation5 + $0x3e8] sm:$0xff] }
  0xb5   :  { %1205 = vmatpush.msra.mxu2 %v731_v56  ;;  %1227 = vmatpush.msra.mxu3 %v765_v57  ;;  %v691_v11 = vld [vmem:[#allocation5 + $0x1150] sm:$0xff]  ;;  %v689_v15 = vld [vmem:[#allocation5 + $0x1140] sm:$0xff]  ;;  %v162_v46 = vld [vmem:[#allocation5 + $0xc8] sm:$0xff] }
  0xb6   :  { %1160 = vmatpush.msra.mxu0 %v665_v58  ;;  %1182 = vmatpush.msra.mxu1 %v699_v59  ;;  %v755_v13 = vld [vmem:[#allocation5 + $0x1350] sm:$0xff]  ;;  %v753_v17 = vld [vmem:[#allocation5 + $0x1340] sm:$0xff]  ;;  %v196_v47 = vld [vmem:[#allocation5 + $0x1d8] sm:$0xff] }
  0xb7   :  { %1206 = vmatpush.msra.mxu2 %v729_v60  ;;  %1228 = vmatpush.msra.mxu3 %v763_v61  ;;  %v655_v14 = vld [vmem:[#allocation5 + $0x1030] sm:$0xff]  ;;  %v653_v18 = vld [vmem:[#allocation5 + $0x1020] sm:$0xff]  ;;  %v226_v48 = vld [vmem:[#allocation5 + $0x2c8] sm:$0xff] }
  0xb8   :  { %1161 = vmatpush.msra.mxu0 %v663_v62  ;;  %1183 = vmatpush.msra.mxu1 %v697_v63  ;;  %v719_v16 = vld [vmem:[#allocation5 + $0x1230] sm:$0xff]  ;;  %v717_v20 = vld [vmem:[#allocation5 + $0x1220] sm:$0xff]  ;;  %v260_v49 = vld [vmem:[#allocation5 + $0x3d8] sm:$0xff] }
  0xb9   :  { %1207 = vmatpush.msra.mxu2 %v727_v0  ;;  %1229 = vmatpush.msra.mxu3 %v761_v1  ;;  %v687_v19 = vld [vmem:[#allocation5 + $0x1130] sm:$0xff]  ;;  %v685_v23 = vld [vmem:[#allocation5 + $0x1120] sm:$0xff]  ;;  %v160_v52 = vld [vmem:[#allocation5 + $0xb8] sm:$0xff] }
  0xba   :  { %1162 = vmatpush.msra.mxu0 %v661_v2  ;;  %1184 = vmatpush.msra.mxu1 %v695_v3  ;;  %v751_v21 = vld [vmem:[#allocation5 + $0x1330] sm:$0xff]  ;;  %v749_v25 = vld [vmem:[#allocation5 + $0x1320] sm:$0xff]  ;;  %v194_v53 = vld [vmem:[#allocation5 + $0x1c8] sm:$0xff] }
  0xbb   :  { %1208 = vmatpush.msra.mxu2 %v725_v4  ;;  %1230 = vmatpush.msra.mxu3 %v759_v5  ;;  %v651_v22 = vld [vmem:[#allocation5 + $0x1010] sm:$0xff]  ;;  %v649_v26 = vld [vmem:[#allocation5 + $0x1000] sm:$0xff]  ;;  %v224_v54 = vld [vmem:[#allocation5 + $0x2b8] sm:$0xff] }
  0xbc   :  { %1163 = vmatpush.msra.mxu0 %v659_v6  ;;  %1185 = vmatpush.msra.mxu1 %v693_v7  ;;  %v715_v24 = vld [vmem:[#allocation5 + $0x1210] sm:$0xff]  ;;  %v713_v28 = vld [vmem:[#allocation5 + $0x1200] sm:$0xff]  ;;  %v258_v55 = vld [vmem:[#allocation5 + $0x3c8] sm:$0xff] }
  0xbd   :  { %1209 = vmatpush.msra.mxu2 %v723_v8  ;;  %1231 = vmatpush.msra.mxu3 %v757_v9  ;;  %v683_v27 = vld [vmem:[#allocation5 + $0x1110] sm:$0xff]  ;;  %v113_v30 = vld [vmem:[#allocation2 + $0x80] sm:$0xff]  ;;  %v134_v56 = vld [vmem:[#allocation2 + $0x128] sm:$0xff] }
  0xbe   :  { %1164 = vmatpush.msra.mxu0 %v657_v10  ;;  %1186 = vmatpush.msra.mxu1 %v691_v11  ;;  %v747_v29 = vld [vmem:[#allocation5 + $0x1310] sm:$0xff]  ;;  %v681_v34 = vld [vmem:[#allocation5 + $0x1100] sm:$0xff]  ;;  %v136_v57 = vld [vmem:[#allocation2 + $0x138] sm:$0xff] }
  0xbf   :  { %1210 = vmatpush.msra.mxu2 %v721_v12  ;;  %1232 = vmatpush.msra.mxu3 %v755_v13  ;;  %v115_v31 = vld [vmem:[#allocation2 + $0x90] sm:$0xff]  ;;  %v745_v35 = vld [vmem:[#allocation5 + $0x1300] sm:$0xff]  ;;  %v158_v58 = vld [vmem:[#allocation5 + $0xa8] sm:$0xff] }
  0xc0   :  { %1165 = vmatpush.msra.mxu0 %v655_v14  ;;  %1187 = vmatpush.msra.mxu1 %v689_v15  ;;  %v133_v50 = vld [vmem:[#allocation2 + $0x120] sm:$0xff]  ;;  %v135_v51 = vld [vmem:[#allocation2 + $0x130] sm:$0xff]  ;;  %v192_v59 = vld [vmem:[#allocation5 + $0x1b8] sm:$0xff] }
  0xc1   :  { %1211 = vmatpush.msra.mxu2 %v719_v16  ;;  %1233 = vmatpush.msra.mxu3 %v753_v17  ;;  %v222_v60 = vld [vmem:[#allocation5 + $0x2a8] sm:$0xff]  ;;  %v256_v61 = vld [vmem:[#allocation5 + $0x3b8] sm:$0xff] }
  0xc2   :  { %1166 = vmatpush.msra.mxu0 %v653_v18  ;;  %1188 = vmatpush.msra.mxu1 %v687_v19  ;;  %v156_v62 = vld [vmem:[#allocation5 + $0x98] sm:$0xff]  ;;  %v190_v63 = vld [vmem:[#allocation5 + $0x1a8] sm:$0xff] }
  0xc3   :  { %1212 = vmatpush.msra.mxu2 %v717_v20  ;;  %1234 = vmatpush.msra.mxu3 %v751_v21  ;;  %v220_v0 = vld [vmem:[#allocation5 + $0x298] sm:$0xff]  ;;  %v254_v1 = vld [vmem:[#allocation5 + $0x3a8] sm:$0xff] }
  0xc4   :  { %1167 = vmatpush.msra.mxu0 %v651_v22  ;;  %1189 = vmatpush.msra.mxu1 %v685_v23  ;;  %v154_v2 = vld [vmem:[#allocation5 + $0x88] sm:$0xff]  ;;  %v188_v3 = vld [vmem:[#allocation5 + $0x198] sm:$0xff] }
  0xc5   :  { %1213 = vmatpush.msra.mxu2 %v715_v24  ;;  %1235 = vmatpush.msra.mxu3 %v749_v25  ;;  %v218_v4 = vld [vmem:[#allocation5 + $0x288] sm:$0xff]  ;;  %v252_v5 = vld [vmem:[#allocation5 + $0x398] sm:$0xff] }
  0xc6   :  { %1168 = vmatpush.msra.mxu0 %v649_v26  ;;  %1190 = vmatpush.msra.mxu1 %v683_v27  ;;  %v152_v6 = vld [vmem:[#allocation5 + $0x78] sm:$0xff]  ;;  %v186_v7 = vld [vmem:[#allocation5 + $0x188] sm:$0xff] }
  0xc7   :  { %1214 = vmatpush.msra.mxu2 %v713_v28  ;;  %1236 = vmatpush.msra.mxu3 %v747_v29  ;;  %v216_v8 = vld [vmem:[#allocation5 + $0x278] sm:$0xff]  ;;  %v250_v9 = vld [vmem:[#allocation5 + $0x388] sm:$0xff] }
  0xc8   :  { %1169 = vmatmul.f32.vlgmr.msra.gmra.mxu0 %v113_v30  ;;  %1215 = vmatmul.f32.vlgmr.msra.gmra.mxu2 %v115_v31  ;;  %v150_v10 = vld [vmem:[#allocation5 + $0x68] sm:$0xff]  ;;  %v184_v11 = vld [vmem:[#allocation5 + $0x178] sm:$0xff] }
  0xc9   :  { %1245 = vmatpush.msrb.mxu0 %v168_v32  ;;  %1291 = vmatpush.msrb.mxu2 %v232_v33  ;;  %v214_v12 = vld [vmem:[#allocation5 + $0x268] sm:$0xff]  ;;  %v248_v13 = vld [vmem:[#allocation5 + $0x378] sm:$0xff] }
  0xca   :  { %1191 = vmatpush.msra.mxu1 %v681_v34  ;;  %1237 = vmatpush.msra.mxu3 %v745_v35  ;;  %v148_v14 = vld [vmem:[#allocation5 + $0x58] sm:$0xff]  ;;  %v182_v15 = vld [vmem:[#allocation5 + $0x168] sm:$0xff] }
  0xcb   :  { %1192 = vmatmul.f32.vlgmr.msra.gmra.mxu1 %v114_v36  ;;  %1238 = vmatmul.f32.vlgmr.msra.gmra.mxu3 %v116_v37  ;;  %v212_v16 = vld [vmem:[#allocation5 + $0x258] sm:$0xff]  ;;  %v246_v17 = vld [vmem:[#allocation5 + $0x368] sm:$0xff] }
  0xcc   :  { %1246 = vmatpush.msrb.mxu0 %v166_v38  ;;  %1268 = vmatpush.msrb.mxu1 %v200_v39  ;;  %v146_v18 = vld [vmem:[#allocation5 + $0x48] sm:$0xff]  ;;  %v180_v19 = vld [vmem:[#allocation5 + $0x158] sm:$0xff] }
  0xcd   :  { %1292 = vmatpush.msrb.mxu2 %v230_v40  ;;  %1314 = vmatpush.msrb.mxu3 %v264_v41  ;;  %v210_v20 = vld [vmem:[#allocation5 + $0x248] sm:$0xff]  ;;  %v244_v21 = vld [vmem:[#allocation5 + $0x358] sm:$0xff] }
  0xce   :  { %1247 = vmatpush.msrb.mxu0 %v164_v42  ;;  %1269 = vmatpush.msrb.mxu1 %v198_v43  ;;  %v144_v22 = vld [vmem:[#allocation5 + $0x38] sm:$0xff]  ;;  %v178_v23 = vld [vmem:[#allocation5 + $0x148] sm:$0xff] }
  0xcf   :  { %1293 = vmatpush.msrb.mxu2 %v228_v44  ;;  %1315 = vmatpush.msrb.mxu3 %v262_v45  ;;  %v208_v24 = vld [vmem:[#allocation5 + $0x238] sm:$0xff]  ;;  %v242_v25 = vld [vmem:[#allocation5 + $0x348] sm:$0xff] }
  0xd0   :  { %1248 = vmatpush.msrb.mxu0 %v162_v46  ;;  %1270 = vmatpush.msrb.mxu1 %v196_v47  ;;  %v142_v26 = vld [vmem:[#allocation5 + $0x28] sm:$0xff]  ;;  %v176_v27 = vld [vmem:[#allocation5 + $0x138] sm:$0xff] }
  0xd1   :  { %1294 = vmatpush.msrb.mxu2 %v226_v48  ;;  %1316 = vmatpush.msrb.mxu3 %v260_v49  ;;  %v206_v28 = vld [vmem:[#allocation5 + $0x228] sm:$0xff]  ;;  %v240_v29 = vld [vmem:[#allocation5 + $0x338] sm:$0xff] }
  0xd2   :  { %1172 = vmatmul.f32.gmra.mxu0 %v133_v50  ;;  %1218 = vmatmul.f32.gmra.mxu2 %v135_v51  ;;  %v140_v30 = vld [vmem:[#allocation5 + $0x18] sm:$0xff]  ;;  %v174_v31 = vld [vmem:[#allocation5 + $0x128] sm:$0xff] }
  0xd3   :  { %1249 = vmatpush.msrb.mxu0 %v160_v52  ;;  %1271 = vmatpush.msrb.mxu1 %v194_v53  ;;  %v204_v32 = vld [vmem:[#allocation5 + $0x218] sm:$0xff]  ;;  %v238_v33 = vld [vmem:[#allocation5 + $0x328] sm:$0xff] }
  0xd4   :  { %1295 = vmatpush.msrb.mxu2 %v224_v54  ;;  %1317 = vmatpush.msrb.mxu3 %v258_v55  ;;  %v138_v34 = vld [vmem:[#allocation5 + $0x8] sm:$0xff]  ;;  %v172_v35 = vld [vmem:[#allocation5 + $0x118] sm:$0xff] }
  0xd5   :  { %1195 = vmatmul.f32.gmra.mxu1 %v134_v56  ;;  %1241 = vmatmul.f32.gmra.mxu3 %v136_v57  ;;  %v202_v36 = vld [vmem:[#allocation5 + $0x208] sm:$0xff]  ;;  %v236_v37 = vld [vmem:[#allocation5 + $0x318] sm:$0xff] }
  0xd6   :  { %1250 = vmatpush.msrb.mxu0 %v158_v58  ;;  %1272 = vmatpush.msrb.mxu1 %v192_v59  ;;  %v296_v38 = vld [vmem:[#allocation5 + $0x4f8] sm:$0xff]  ;;  %v170_v40 = vld [vmem:[#allocation5 + $0x108] sm:$0xff] }
  0xd7   :  { %1296 = vmatpush.msrb.mxu2 %v222_v60  ;;  %1318 = vmatpush.msrb.mxu3 %v256_v61  ;;  %v360_v39 = vld [vmem:[#allocation5 + $0x6f8] sm:$0xff]  ;;  %v234_v41 = vld [vmem:[#allocation5 + $0x308] sm:$0xff] }
  0xd8   :  { %1251 = vmatpush.msrb.mxu0 %v156_v62  ;;  %1273 = vmatpush.msrb.mxu1 %v190_v63  ;;  %v294_v42 = vld [vmem:[#allocation5 + $0x4e8] sm:$0xff]  ;;  %v328_v43 = vld [vmem:[#allocation5 + $0x5f8] sm:$0xff] }
  0xd9   :  { %1297 = vmatpush.msrb.mxu2 %v220_v0  ;;  %1319 = vmatpush.msrb.mxu3 %v254_v1  ;;  %v358_v44 = vld [vmem:[#allocation5 + $0x6e8] sm:$0xff]  ;;  %v392_v45 = vld [vmem:[#allocation5 + $0x7f8] sm:$0xff] }
  0xda   :  { %1252 = vmatpush.msrb.mxu0 %v154_v2  ;;  %1274 = vmatpush.msrb.mxu1 %v188_v3  ;;  %v292_v46 = vld [vmem:[#allocation5 + $0x4d8] sm:$0xff]  ;;  %v326_v47 = vld [vmem:[#allocation5 + $0x5e8] sm:$0xff] }
  0xdb   :  { %1298 = vmatpush.msrb.mxu2 %v218_v4  ;;  %1320 = vmatpush.msrb.mxu3 %v252_v5  ;;  %v356_v48 = vld [vmem:[#allocation5 + $0x6d8] sm:$0xff]  ;;  %v390_v49 = vld [vmem:[#allocation5 + $0x7e8] sm:$0xff] }
  0xdc   :  { %1253 = vmatpush.msrb.mxu0 %v152_v6  ;;  %1275 = vmatpush.msrb.mxu1 %v186_v7  ;;  %v290_v50 = vld [vmem:[#allocation5 + $0x4c8] sm:$0xff]  ;;  %v324_v51 = vld [vmem:[#allocation5 + $0x5d8] sm:$0xff] }
  0xdd   :  { %1299 = vmatpush.msrb.mxu2 %v216_v8  ;;  %1321 = vmatpush.msrb.mxu3 %v250_v9  ;;  %v354_v52 = vld [vmem:[#allocation5 + $0x6c8] sm:$0xff]  ;;  %v388_v53 = vld [vmem:[#allocation5 + $0x7d8] sm:$0xff] }
  0xde   :  { %1254 = vmatpush.msrb.mxu0 %v150_v10  ;;  %1276 = vmatpush.msrb.mxu1 %v184_v11  ;;  %v288_v54 = vld [vmem:[#allocation5 + $0x4b8] sm:$0xff]  ;;  %v322_v55 = vld [vmem:[#allocation5 + $0x5c8] sm:$0xff] }
  0xdf   :  { %1300 = vmatpush.msrb.mxu2 %v214_v12  ;;  %1322 = vmatpush.msrb.mxu3 %v248_v13  ;;  %v352_v56 = vld [vmem:[#allocation5 + $0x6b8] sm:$0xff]  ;;  %v386_v57 = vld [vmem:[#allocation5 + $0x7c8] sm:$0xff] }
  0xe0   :  { %1255 = vmatpush.msrb.mxu0 %v148_v14  ;;  %1277 = vmatpush.msrb.mxu1 %v182_v15  ;;  %v286_v58 = vld [vmem:[#allocation5 + $0x4a8] sm:$0xff]  ;;  %v320_v59 = vld [vmem:[#allocation5 + $0x5b8] sm:$0xff] }
  0xe1   :  { %1301 = vmatpush.msrb.mxu2 %v212_v16  ;;  %1323 = vmatpush.msrb.mxu3 %v246_v17  ;;  %v350_v60 = vld [vmem:[#allocation5 + $0x6a8] sm:$0xff]  ;;  %v384_v61 = vld [vmem:[#allocation5 + $0x7b8] sm:$0xff] }
  0xe2   :  { %1256 = vmatpush.msrb.mxu0 %v146_v18  ;;  %1278 = vmatpush.msrb.mxu1 %v180_v19  ;;  %v284_v62 = vld [vmem:[#allocation5 + $0x498] sm:$0xff]  ;;  %v318_v63 = vld [vmem:[#allocation5 + $0x5a8] sm:$0xff] }
  0xe3   :  { %1302 = vmatpush.msrb.mxu2 %v210_v20  ;;  %1324 = vmatpush.msrb.mxu3 %v244_v21  ;;  %v348_v0 = vld [vmem:[#allocation5 + $0x698] sm:$0xff]  ;;  %v382_v1 = vld [vmem:[#allocation5 + $0x7a8] sm:$0xff] }
  0xe4   :  { %1257 = vmatpush.msrb.mxu0 %v144_v22  ;;  %1279 = vmatpush.msrb.mxu1 %v178_v23  ;;  %v282_v2 = vld [vmem:[#allocation5 + $0x488] sm:$0xff]  ;;  %v316_v3 = vld [vmem:[#allocation5 + $0x598] sm:$0xff] }
  0xe5   :  { %1303 = vmatpush.msrb.mxu2 %v208_v24  ;;  %1325 = vmatpush.msrb.mxu3 %v242_v25  ;;  %v346_v4 = vld [vmem:[#allocation5 + $0x688] sm:$0xff]  ;;  %v380_v5 = vld [vmem:[#allocation5 + $0x798] sm:$0xff] }
  0xe6   :  { %1258 = vmatpush.msrb.mxu0 %v142_v26  ;;  %1280 = vmatpush.msrb.mxu1 %v176_v27  ;;  %v280_v6 = vld [vmem:[#allocation5 + $0x478] sm:$0xff]  ;;  %v314_v7 = vld [vmem:[#allocation5 + $0x588] sm:$0xff]  ;;  %v1849_v26 = vld [vmem:[#allocation2 + $0x10] sm:$0xff] }
  0xe7   :  { %1304 = vmatpush.msrb.mxu2 %v206_v28  ;;  %1326 = vmatpush.msrb.mxu3 %v240_v29  ;;  %v344_v8 = vld [vmem:[#allocation5 + $0x678] sm:$0xff]  ;;  %v378_v9 = vld [vmem:[#allocation5 + $0x788] sm:$0xff] }
  0xe8   :  { %1259 = vmatpush.msrb.mxu0 %v140_v30  ;;  %1281 = vmatpush.msrb.mxu1 %v174_v31  ;;  %v278_v10 = vld [vmem:[#allocation5 + $0x468] sm:$0xff]  ;;  %v312_v11 = vld [vmem:[#allocation5 + $0x578] sm:$0xff]  ;;  %v1850_v30 = vld [vmem:[#allocation2] sm:$0xff] }
  0xe9   :  { %1305 = vmatpush.msrb.mxu2 %v204_v32  ;;  %1327 = vmatpush.msrb.mxu3 %v238_v33  ;;  %v342_v12 = vld [vmem:[#allocation5 + $0x668] sm:$0xff]  ;;  %v376_v13 = vld [vmem:[#allocation5 + $0x778] sm:$0xff] }
  0xea   :  { %1260 = vmatpush.msrb.mxu0 %v138_v34  ;;  %1282 = vmatpush.msrb.mxu1 %v172_v35  ;;  %v276_v14 = vld [vmem:[#allocation5 + $0x458] sm:$0xff]  ;;  %v310_v15 = vld [vmem:[#allocation5 + $0x568] sm:$0xff] }
  0xeb   :  { %1306 = vmatpush.msrb.mxu2 %v202_v36  ;;  %1328 = vmatpush.msrb.mxu3 %v236_v37  ;;  %v340_v16 = vld [vmem:[#allocation5 + $0x658] sm:$0xff]  ;;  %v374_v17 = vld [vmem:[#allocation5 + $0x768] sm:$0xff] }
  0xec   :  { %1337 = vmatpush.msra.mxu0 %v296_v38  ;;  %1283 = vmatpush.msrb.mxu1 %v170_v40  ;;  %v274_v18 = vld [vmem:[#allocation5 + $0x448] sm:$0xff]  ;;  %v308_v19 = vld [vmem:[#allocation5 + $0x558] sm:$0xff] }
  0xed   :  { %1383 = vmatpush.msra.mxu2 %v360_v39  ;;  %1329 = vmatpush.msrb.mxu3 %v234_v41  ;;  %v338_v20 = vld [vmem:[#allocation5 + $0x648] sm:$0xff]  ;;  %v372_v21 = vld [vmem:[#allocation5 + $0x758] sm:$0xff] }
  0xee   :  { %1338 = vmatpush.msra.mxu0 %v294_v42  ;;  %1360 = vmatpush.msra.mxu1 %v328_v43  ;;  %v272_v22 = vld [vmem:[#allocation5 + $0x438] sm:$0xff]  ;;  %v306_v23 = vld [vmem:[#allocation5 + $0x548] sm:$0xff] }
  0xef   :  { %1384 = vmatpush.msra.mxu2 %v358_v44  ;;  %1406 = vmatpush.msra.mxu3 %v392_v45  ;;  %v336_v24 = vld [vmem:[#allocation5 + $0x638] sm:$0xff]  ;;  %v370_v25 = vld [vmem:[#allocation5 + $0x748] sm:$0xff] }
  0xf0   :  { %1339 = vmatpush.msra.mxu0 %v292_v46  ;;  %1361 = vmatpush.msra.mxu1 %v326_v47  ;;  %v270_v27 = vld [vmem:[#allocation5 + $0x428] sm:$0xff]  ;;  %v304_v28 = vld [vmem:[#allocation5 + $0x538] sm:$0xff]  ;;  %v1853_v46 = vld [vmem:[#allocation2 + $0xb0] sm:$0xff] }
  0xf1   :  { %1385 = vmatpush.msra.mxu2 %v356_v48  ;;  %1407 = vmatpush.msra.mxu3 %v390_v49  ;;  %v334_v29 = vld [vmem:[#allocation5 + $0x628] sm:$0xff]  ;;  %v368_v31 = vld [vmem:[#allocation5 + $0x738] sm:$0xff] }
  0xf2   :  { %1340 = vmatpush.msra.mxu0 %v290_v50  ;;  %1362 = vmatpush.msra.mxu1 %v324_v51  ;;  %v1851_v32 = vld [vmem:[#allocation2 + $0x18] sm:$0xff]  ;;  %v302_v34 = vld [vmem:[#allocation5 + $0x528] sm:$0xff]  ;;  %v1854_v50 = vld [vmem:[#allocation2 + $0xa0] sm:$0xff] }
  0xf3   :  { %1386 = vmatpush.msra.mxu2 %v354_v52  ;;  %1408 = vmatpush.msra.mxu3 %v388_v53  ;;  %v268_v33 = vld [vmem:[#allocation5 + $0x418] sm:$0xff]  ;;  %v366_v36 = vld [vmem:[#allocation5 + $0x728] sm:$0xff] }
  0xf4   :  { %1341 = vmatpush.msra.mxu0 %v288_v54  ;;  %1363 = vmatpush.msra.mxu1 %v322_v55  ;;  %v332_v35 = vld [vmem:[#allocation5 + $0x618] sm:$0xff]  ;;  %v1852_v37 = vld [vmem:[#allocation2 + $0x8] sm:$0xff] }
  0xf5   :  { %1387 = vmatpush.msra.mxu2 %v352_v56  ;;  %1409 = vmatpush.msra.mxu3 %v386_v57  ;;  %v266_v38 = vld [vmem:[#allocation5 + $0x408] sm:$0xff]  ;;  %v300_v39 = vld [vmem:[#allocation5 + $0x518] sm:$0xff] }
  0xf6   :  { %1342 = vmatpush.msra.mxu0 %v286_v58  ;;  %1364 = vmatpush.msra.mxu1 %v320_v59  ;;  %v330_v40 = vld [vmem:[#allocation5 + $0x608] sm:$0xff]  ;;  %v364_v41 = vld [vmem:[#allocation5 + $0x718] sm:$0xff] }
  0xf7   :  { %1388 = vmatpush.msra.mxu2 %v350_v60  ;;  %1410 = vmatpush.msra.mxu3 %v384_v61  ;;  %v424_v42 = vld [vmem:[#allocation5 + $0x8f8] sm:$0xff]  ;;  %v298_v44 = vld [vmem:[#allocation5 + $0x508] sm:$0xff] }
  0xf8   :  { %1343 = vmatpush.msra.mxu0 %v284_v62  ;;  %1365 = vmatpush.msra.mxu1 %v318_v63  ;;  %v488_v43 = vld [vmem:[#allocation5 + $0xaf8] sm:$0xff]  ;;  %v362_v45 = vld [vmem:[#allocation5 + $0x708] sm:$0xff] }
  0xf9   :  { %1389 = vmatpush.msra.mxu2 %v348_v0  ;;  %1411 = vmatpush.msra.mxu3 %v382_v1  ;;  %v422_v47 = vld [vmem:[#allocation5 + $0x8e8] sm:$0xff]  ;;  %v456_v48 = vld [vmem:[#allocation5 + $0x9f8] sm:$0xff] }
  0xfa   :  { %1344 = vmatpush.msra.mxu0 %v282_v2  ;;  %1366 = vmatpush.msra.mxu1 %v316_v3  ;;  %v486_v49 = vld [vmem:[#allocation5 + $0xae8] sm:$0xff]  ;;  %v520_v51 = vld [vmem:[#allocation5 + $0xbf8] sm:$0xff]  ;;  %v2099_v2 = vpop.f32.mrf.mxu0  ;;  %v1857_v3 = vld [vmem:[#allocation2 + $0x30] sm:$0xff] }
  0xfb   :  { %1390 = vmatpush.msra.mxu2 %v346_v4  ;;  %1412 = vmatpush.msra.mxu3 %v380_v5  ;;  %v1855_v52 = vld [vmem:[#allocation2 + $0xb8] sm:$0xff]  ;;  %v454_v54 = vld [vmem:[#allocation5 + $0x9e8] sm:$0xff] }
  0xfc   :  { %1345 = vmatpush.msra.mxu0 %v280_v6  ;;  %1367 = vmatpush.msra.mxu1 %v314_v7  ;;  %v420_v53 = vld [vmem:[#allocation5 + $0x8d8] sm:$0xff]  ;;  %v518_v56 = vld [vmem:[#allocation5 + $0xbe8] sm:$0xff]  ;;  %v1858_v7 = vld [vmem:[#allocation2 + $0x20] sm:$0xff] }
  0xfd   :  { %1391 = vmatpush.msra.mxu2 %v344_v8  ;;  %1413 = vmatpush.msra.mxu3 %v378_v9  ;;  %v484_v55 = vld [vmem:[#allocation5 + $0xad8] sm:$0xff]  ;;  %v1856_v57 = vld [vmem:[#allocation2 + $0xa8] sm:$0xff] }
  0xfe   :  { %1346 = vmatpush.msra.mxu0 %v278_v10  ;;  %1368 = vmatpush.msra.mxu1 %v312_v11  ;;  %v418_v58 = vld [vmem:[#allocation5 + $0x8c8] sm:$0xff]  ;;  %v452_v59 = vld [vmem:[#allocation5 + $0x9d8] sm:$0xff] }
  0xff   :  { %1392 = vmatpush.msra.mxu2 %v342_v12  ;;  %1414 = vmatpush.msra.mxu3 %v376_v13  ;;  %v482_v60 = vld [vmem:[#allocation5 + $0xac8] sm:$0xff]  ;;  %v516_v61 = vld [vmem:[#allocation5 + $0xbd8] sm:$0xff]  ;;  %v2101_v12 = vpop.f32.mrf.mxu1  ;;  %v2103_v13 = vpop.f32.mrf.mxu2 }
 0x100   :  { %1347 = vmatpush.msra.mxu0 %v276_v14  ;;  %1369 = vmatpush.msra.mxu1 %v310_v15  ;;  %v416_v62 = vld [vmem:[#allocation5 + $0x8b8] sm:$0xff]  ;;  %v450_v63 = vld [vmem:[#allocation5 + $0x9c8] sm:$0xff] }
 0x101   :  { %1393 = vmatpush.msra.mxu2 %v340_v16  ;;  %1415 = vmatpush.msra.mxu3 %v374_v17  ;;  %v480_v0 = vld [vmem:[#allocation5 + $0xab8] sm:$0xff]  ;;  %v514_v1 = vld [vmem:[#allocation5 + $0xbc8] sm:$0xff] }
 0x102   :  { %1348 = vmatpush.msra.mxu0 %v274_v18  ;;  %1370 = vmatpush.msra.mxu1 %v308_v19  ;;  %v414_v4 = vld [vmem:[#allocation5 + $0x8a8] sm:$0xff]  ;;  %v448_v5 = vld [vmem:[#allocation5 + $0x9b8] sm:$0xff] }
 0x103   :  { %1394 = vmatpush.msra.mxu2 %v338_v20  ;;  %1416 = vmatpush.msra.mxu3 %v372_v21  ;;  %v478_v6 = vld [vmem:[#allocation5 + $0xaa8] sm:$0xff]  ;;  %v512_v8 = vld [vmem:[#allocation5 + $0xbb8] sm:$0xff] }
 0x104   :  { %1307 = vmatmul.f32.vlgmr.msrb.gmra.mxu2 %v1849_v26  ;;  %1349 = vmatpush.msra.mxu0 %v272_v22  ;;  %v1859_v9 = vld [vmem:[#allocation2 + $0x38] sm:$0xff]  ;;  %v446_v11 = vld [vmem:[#allocation5 + $0x9a8] sm:$0xff] }
 0x105   :  { %1371 = vmatpush.msra.mxu1 %v306_v23  ;;  %1395 = vmatpush.msra.mxu2 %v336_v24  ;;  %v412_v10 = vld [vmem:[#allocation5 + $0x898] sm:$0xff]  ;;  %v510_v15 = vld [vmem:[#allocation5 + $0xba8] sm:$0xff]  ;;  %v2105_v23 = vpop.f32.mrf.mxu3 }
 0x106   :  { %1417 = vmatpush.msra.mxu3 %v370_v25  ;;  %1261 = vmatmul.f32.vlgmr.msrb.gmra.mxu0 %v1850_v30  ;;  %v476_v14 = vld [vmem:[#allocation5 + $0xa98] sm:$0xff]  ;;  %v1860_v16 = vld [vmem:[#allocation2 + $0x28] sm:$0xff] }
 0x107   :  { %1330 = vmatmul.f32.vlgmr.msrb.gmra.mxu3 %v1851_v32  ;;  %1350 = vmatpush.msra.mxu0 %v270_v27  ;;  %v410_v17 = vld [vmem:[#allocation5 + $0x888] sm:$0xff]  ;;  %v444_v18 = vld [vmem:[#allocation5 + $0x998] sm:$0xff] }
 0x108   :  { %1372 = vmatpush.msra.mxu1 %v304_v28  ;;  %1396 = vmatpush.msra.mxu2 %v334_v29  ;;  %v474_v19 = vld [vmem:[#allocation5 + $0xa88] sm:$0xff]  ;;  %v508_v20 = vld [vmem:[#allocation5 + $0xb98] sm:$0xff]  ;;  %v2107_v28 = vpop.f32.mrf.mxu0 }
 0x109   :  { %1418 = vmatpush.msra.mxu3 %v368_v31  ;;  %1284 = vmatmul.f32.vlgmr.msrb.gmra.mxu1 %v1852_v37  ;;  %v408_v21 = vld [vmem:[#allocation5 + $0x878] sm:$0xff]  ;;  %v442_v22 = vld [vmem:[#allocation5 + $0x988] sm:$0xff]  ;;  %v2109_v37 = vpop.f32.mrf.mxu1 }
 0x10a   :  { %1351 = vmatpush.msra.mxu0 %v268_v33  ;;  %1373 = vmatpush.msra.mxu1 %v302_v34  ;;  %v472_v24 = vld [vmem:[#allocation5 + $0xa78] sm:$0xff]  ;;  %v506_v25 = vld [vmem:[#allocation5 + $0xb88] sm:$0xff] }
 0x10b   :  { %1397 = vmatpush.msra.mxu2 %v332_v35  ;;  %1419 = vmatpush.msra.mxu3 %v366_v36  ;;  %v406_v26 = vld [vmem:[#allocation5 + $0x868] sm:$0xff]  ;;  %v440_v27 = vld [vmem:[#allocation5 + $0x978] sm:$0xff] }
 0x10c   :  { %1352 = vmatpush.msra.mxu0 %v266_v38  ;;  %1374 = vmatpush.msra.mxu1 %v300_v39  ;;  %v470_v29 = vld [vmem:[#allocation5 + $0xa68] sm:$0xff]  ;;  %v504_v30 = vld [vmem:[#allocation5 + $0xb78] sm:$0xff]  ;;  %v2111_v38 = vpop.f32.mrf.mxu2 }
 0x10d   :  { %1398 = vmatpush.msra.mxu2 %v330_v40  ;;  %1420 = vmatpush.msra.mxu3 %v364_v41  ;;  %v404_v31 = vld [vmem:[#allocation5 + $0x858] sm:$0xff]  ;;  %v438_v32 = vld [vmem:[#allocation5 + $0x968] sm:$0xff] }
 0x10e   :  { %1310 = vmatmul.f32.gmra.mxu2 %v1853_v46  ;;  %1429 = vmatpush.msrb.mxu0 %v424_v42  ;;  %v468_v33 = vld [vmem:[#allocation5 + $0xa58] sm:$0xff]  ;;  %v502_v34 = vld [vmem:[#allocation5 + $0xb68] sm:$0xff]  ;;  %v2115_v46 = vpop.f32.mrf.mxu3 }
 0x10f   :  { %1475 = vmatpush.msrb.mxu2 %v488_v43  ;;  %1375 = vmatpush.msra.mxu1 %v298_v44  ;;  %v402_v35 = vld [vmem:[#allocation5 + $0x848] sm:$0xff]  ;;  %v436_v36 = vld [vmem:[#allocation5 + $0x958] sm:$0xff] }
 0x110   :  { %1421 = vmatpush.msra.mxu3 %v362_v45  ;;  %1264 = vmatmul.f32.gmra.mxu0 %v1854_v50  ;;  %v466_v39 = vld [vmem:[#allocation5 + $0xa48] sm:$0xff]  ;;  %v500_v40 = vld [vmem:[#allocation5 + $0xb58] sm:$0xff]  ;;  %v2113_v45 = vld [vmem:[#allocation7] sm:$0xf] }
 0x111   :  { %1333 = vmatmul.f32.gmra.mxu3 %v1855_v52  ;;  %1430 = vmatpush.msrb.mxu0 %v422_v47  ;;  %v400_v41 = vld [vmem:[#allocation5 + $0x838] sm:$0xff]  ;;  %v434_v42 = vld [vmem:[#allocation5 + $0x948] sm:$0xff]  ;;  %v1861_v47 = vld [vmem:[#allocation2 + $0xc0] sm:$0xff] }
 0x112   :  { %1452 = vmatpush.msrb.mxu1 %v456_v48  ;;  %1476 = vmatpush.msrb.mxu2 %v486_v49  ;;  %v464_v43 = vld [vmem:[#allocation5 + $0xa38] sm:$0xff]  ;;  %v498_v44 = vld [vmem:[#allocation5 + $0xb48] sm:$0xff]  ;;  %v1862_v48 = vld [vmem:[#allocation2 + $0xd0] sm:$0xff] }
 0x113   :  { %1498 = vmatpush.msrb.mxu3 %v520_v51  ;;  %1287 = vmatmul.f32.gmra.mxu1 %v1856_v57  ;;  %v398_v49 = vld [vmem:[#allocation5 + $0x828] sm:$0xff]  ;;  %v432_v50 = vld [vmem:[#allocation5 + $0x938] sm:$0xff]  ;;  %v2117_v51 = vpop.f32.mrf.mxu0 }
 0x114   :  { %1431 = vmatpush.msrb.mxu0 %v420_v53  ;;  %1453 = vmatpush.msrb.mxu1 %v454_v54  ;;  %v462_v52 = vld [vmem:[#allocation5 + $0xa28] sm:$0xff]  ;;  %v496_v53 = vld [vmem:[#allocation5 + $0xb38] sm:$0xff]  ;;  %v779_v54 = vperm.slane %v2113_v45, 0 }
 0x115   :  { %1477 = vmatpush.msrb.mxu2 %v484_v55  ;;  %1499 = vmatpush.msrb.mxu3 %v518_v56  ;;  %v1863_v55 = vld [vmem:[#allocation2 + $0xc8] sm:$0xff]  ;;  %v1864_v56 = vld [vmem:[#allocation2 + $0xd8] sm:$0xff] }
 0x116   :  { %1432 = vmatpush.msrb.mxu0 %v418_v58  ;;  %1454 = vmatpush.msrb.mxu1 %v452_v59  ;;  %v396_v57 = vld [vmem:[#allocation5 + $0x818] sm:$0xff]  ;;  %v430_v58 = vld [vmem:[#allocation5 + $0x928] sm:$0xff] }
 0x117   :  { %1478 = vmatpush.msrb.mxu2 %v482_v60  ;;  %1500 = vmatpush.msrb.mxu3 %v516_v61  ;;  %v460_v59 = vld [vmem:[#allocation5 + $0xa18] sm:$0xff]  ;;  %v494_v60 = vld [vmem:[#allocation5 + $0xb28] sm:$0xff] }
 0x118   :  { %1399 = vmatmul.f32.vlgmr.msra.gmra.mxu2 %v1857_v3  ;;  %1433 = vmatpush.msrb.mxu0 %v416_v62  ;;  %v394_v61 = vld [vmem:[#allocation5 + $0x808] sm:$0xff]  ;;  %v428_v62 = vld [vmem:[#allocation5 + $0x918] sm:$0xff] }
 0x119   :  { %1455 = vmatpush.msrb.mxu1 %v450_v63  ;;  %1479 = vmatpush.msrb.mxu2 %v480_v0  ;;  %v2120_v63 = vpop.f32.mrf.mxu1  ;;  %v2122_v0 = vpop.f32.mrf.mxu2  ;;  %v492_v3 = vld [vmem:[#allocation5 + $0xb18] sm:$0xff] }
 0x11a   :  { %1501 = vmatpush.msrb.mxu3 %v514_v1  ;;  %1353 = vmatmul.f32.vlgmr.msra.gmra.mxu0 %v1858_v7  ;;  %v458_v1 = vld [vmem:[#allocation5 + $0xa08] sm:$0xff] }
 0x11b   :  { %1422 = vmatmul.f32.vlgmr.msra.gmra.mxu3 %v1859_v9  ;;  %1434 = vmatpush.msrb.mxu0 %v414_v4  ;;  %v783_v4 = vperm.slane %v779_v54, 0  ;;  %v490_v9 = vld [vmem:[#allocation5 + $0xb08] sm:$0xff] }
 0x11c   :  { %1456 = vmatpush.msrb.mxu1 %v448_v5  ;;  %1480 = vmatpush.msrb.mxu2 %v478_v6  ;;  %v552_v5 = vld [vmem:[#allocation5 + $0xcf8] sm:$0xff]  ;;  %v574_v54 = vld [vmem:[#allocation5 + $0xda8] sm:$0xff] }
 0x11d   :  { %1502 = vmatpush.msrb.mxu3 %v512_v8  ;;  %1376 = vmatmul.f32.vlgmr.msra.gmra.mxu1 %v1860_v16  ;;  %v616_v6 = vld [vmem:[#allocation5 + $0xef8] sm:$0xff]  ;;  %v806_v7 = vadd.f32 %v2107_v28, %v783_v4  ;;  %v426_v8 = vld [vmem:[#allocation5 + $0x908] sm:$0xff] }
 0x11e   :  { %1435 = vmatpush.msrb.mxu0 %v412_v10  ;;  %1457 = vmatpush.msrb.mxu1 %v446_v11  ;;  %v2125_v10 = vpop.f32.mrf.mxu3  ;;  %v2127_v11 = vpop.f32.mrf.mxu0  ;;  %v550_v16 = vld [vmem:[#allocation5 + $0xce8] sm:$0xff]  ;;  %v612_v28 = vld [vmem:[#allocation5 + $0xed8] sm:$0xff] }
 0x11f   :  { %1481 = vmatpush.msrb.mxu2 %v476_v14  ;;  %1503 = vmatpush.msrb.mxu3 %v510_v15  ;;  %v1865_v14 = vld [vmem:[#allocation2 + $0x40] sm:$0xff]  ;;  %v1866_v15 = vld [vmem:[#allocation2 + $0x50] sm:$0xff] }
 0x120   :  { %1436 = vmatpush.msrb.mxu0 %v410_v17  ;;  %1458 = vmatpush.msrb.mxu1 %v444_v18  ;;  %v584_v17 = vld [vmem:[#allocation5 + $0xdf8] sm:$0xff]  ;;  %v614_v18 = vld [vmem:[#allocation5 + $0xee8] sm:$0xff] }
 0x121   :  { %1482 = vmatpush.msrb.mxu2 %v474_v19  ;;  %1504 = vmatpush.msrb.mxu3 %v508_v20  ;;  %v648_v19 = vld [vmem:[#allocation5 + $0xff8] sm:$0xff]  ;;  %v829_v20 = vadd.f32 %v2109_v37, %v806_v7 }
 0x122   :  { %1437 = vmatpush.msrb.mxu0 %v408_v21  ;;  %1459 = vmatpush.msrb.mxu1 %v442_v22  ;;  %v1867_v21 = vld [vmem:[#allocation2 + $0x48] sm:$0xff]  ;;  %v1868_v22 = vld [vmem:[#allocation2 + $0x58] sm:$0xff] }
 0x123   :  { %1483 = vmatpush.msrb.mxu2 %v472_v24  ;;  %1505 = vmatpush.msrb.mxu3 %v506_v25  ;;  %v548_v24 = vld [vmem:[#allocation5 + $0xcd8] sm:$0xff]  ;;  %v582_v25 = vld [vmem:[#allocation5 + $0xde8] sm:$0xff] }
 0x124   :  { %1438 = vmatpush.msrb.mxu0 %v406_v26  ;;  %1460 = vmatpush.msrb.mxu1 %v440_v27  ;;  %v2130_v26 = vpop.f32.mrf.mxu1  ;;  %v2132_v27 = vpop.f32.mrf.mxu2  ;;  %v600_v7 = vld [vmem:[#allocation5 + $0xe78] sm:$0xff] }
 0x125   :  { %1484 = vmatpush.msrb.mxu2 %v470_v29  ;;  %1506 = vmatpush.msrb.mxu3 %v504_v30  ;;  %v646_v29 = vld [vmem:[#allocation5 + $0xfe8] sm:$0xff]  ;;  %v803_v30 = vadd.f32 %v2099_v2, %v783_v4 }
 0x126   :  { %1439 = vmatpush.msrb.mxu0 %v404_v31  ;;  %1461 = vmatpush.msrb.mxu1 %v438_v32  ;;  %v546_v31 = vld [vmem:[#allocation5 + $0xcc8] sm:$0xff]  ;;  %v580_v32 = vld [vmem:[#allocation5 + $0xdd8] sm:$0xff]  ;;  %v2136_v37 = vpop.f32.mrf.mxu3 }
 0x127   :  { %1485 = vmatpush.msrb.mxu2 %v468_v33  ;;  %1507 = vmatpush.msrb.mxu3 %v502_v34  ;;  %v610_v33 = vld [vmem:[#allocation5 + $0xec8] sm:$0xff]  ;;  %v644_v34 = vld [vmem:[#allocation5 + $0xfd8] sm:$0xff]  ;;  %v826_v2 = vadd.f32 %v2101_v12, %v803_v30 }
 0x128   :  { %1440 = vmatpush.msrb.mxu0 %v402_v35  ;;  %1462 = vmatpush.msrb.mxu1 %v436_v36  ;;  %v852_v35 = vadd.f32 %v2111_v38, %v829_v20  ;;  %v544_v36 = vld [vmem:[#allocation5 + $0xcb8] sm:$0xff]  ;;  %v542_v38 = vld [vmem:[#allocation5 + $0xca8] sm:$0xff] }
 0x129   :  { %1486 = vmatpush.msrb.mxu2 %v466_v39  ;;  %1508 = vmatpush.msrb.mxu3 %v500_v40  ;;  %v578_v39 = vld [vmem:[#allocation5 + $0xdc8] sm:$0xff]  ;;  %v608_v40 = vld [vmem:[#allocation5 + $0xeb8] sm:$0xff]  ;;  %v849_v12 = vadd.f32 %v2103_v13, %v826_v2 }
 0x12a   :  { %1356 = vmatmul.f32.gmra.mxu0 %v1861_v47  ;;  %1402 = vmatmul.f32.gmra.mxu2 %v1862_v48  ;;  %v576_v47 = vld [vmem:[#allocation5 + $0xdb8] sm:$0xff]  ;;  %v606_v48 = vld [vmem:[#allocation5 + $0xea8] sm:$0xff] }
 0x12b   :  { %1441 = vmatpush.msrb.mxu0 %v400_v41  ;;  %1463 = vmatpush.msrb.mxu1 %v434_v42  ;;  %v642_v41 = vld [vmem:[#allocation5 + $0xfc8] sm:$0xff]  ;;  %v2139_v42 = vpop.f32.mrf.mxu0  ;;  %v572_v13 = vld [vmem:[#allocation5 + $0xd98] sm:$0xff] }
 0x12c   :  { %1487 = vmatpush.msrb.mxu2 %v464_v43  ;;  %1509 = vmatpush.msrb.mxu3 %v498_v44  ;;  %v1869_v43 = vld [vmem:[#allocation2 + $0xf0] sm:$0xff]  ;;  %v875_v44 = vadd.f32 %v2115_v46, %v852_v35  ;;  %v604_v46 = vld [vmem:[#allocation5 + $0xe98] sm:$0xff]  ;;  %v570_v4 = vld [vmem:[#allocation5 + $0xd88] sm:$0xff] }
 0x12d   :  { %1379 = vmatmul.f32.gmra.mxu1 %v1863_v55  ;;  %1425 = vmatmul.f32.gmra.mxu3 %v1864_v56  ;;  %v2143_v55 = vpop.f32.mrf.mxu1  ;;  %v2145_v56 = vpop.f32.mrf.mxu2  ;;  %v596_v20 = vld [vmem:[#allocation5 + $0xe58] sm:$0xff]  ;;  %v526_v35 = vld [vmem:[#allocation5 + $0xc28] sm:$0xff] }
 0x12e   :  { %1442 = vmatpush.msrb.mxu0 %v398_v49  ;;  %1464 = vmatpush.msrb.mxu1 %v432_v50  ;;  %v1870_v49 = vld [vmem:[#allocation2 + $0xe0] sm:$0xff]  ;;  %v640_v50 = vld [vmem:[#allocation5 + $0xfb8] sm:$0xff] }
 0x12f   :  { %1488 = vmatpush.msrb.mxu2 %v462_v52  ;;  %1510 = vmatpush.msrb.mxu3 %v496_v53  ;;  %v1871_v52 = vld [vmem:[#allocation2 + $0xf8] sm:$0xff] }
 0x130   :  { %1443 = vmatpush.msrb.mxu0 %v396_v57  ;;  %1465 = vmatpush.msrb.mxu1 %v430_v58  ;;  %v540_v53 = vld [vmem:[#allocation5 + $0xc98] sm:$0xff]  ;;  %v638_v57 = vld [vmem:[#allocation5 + $0xfa8] sm:$0xff]  ;;  %v898_v58 = vadd.f32 %v2127_v11, %v875_v44 }
 0x131   :  { %1489 = vmatpush.msrb.mxu2 %v460_v59  ;;  %1511 = vmatpush.msrb.mxu3 %v494_v60  ;;  %v1872_v59 = vld [vmem:[#allocation2 + $0xe8] sm:$0xff]  ;;  %v528_v30 = vld [vmem:[#allocation5 + $0xc38] sm:$0xff] }
 0x132   :  { %1444 = vmatpush.msrb.mxu0 %v394_v61  ;;  %1466 = vmatpush.msrb.mxu1 %v428_v62  ;;  %v538_v60 = vld [vmem:[#allocation5 + $0xc88] sm:$0xff]  ;;  %v636_v62 = vld [vmem:[#allocation5 + $0xf98] sm:$0xff] }
 0x133   :  { %1490 = vmatpush.msrb.mxu2 %v458_v1  ;;  %1512 = vmatpush.msrb.mxu3 %v492_v3  ;;  %v602_v61 = vld [vmem:[#allocation5 + $0xe88] sm:$0xff]  ;;  %v872_v1 = vadd.f32 %v2105_v23, %v849_v12  ;;  %v536_v3 = vld [vmem:[#allocation5 + $0xc78] sm:$0xff] }
 0x134   :  { %1445 = vmatmul.f32.vlgmr.msrb.gmra.mxu0 %v1865_v14  ;;  %1491 = vmatmul.f32.vlgmr.msrb.gmra.mxu2 %v1866_v15  ;;  %v534_v11 = vld [vmem:[#allocation5 + $0xc68] sm:$0xff]  ;;  %v568_v14 = vld [vmem:[#allocation5 + $0xd78] sm:$0xff] }
 0x135   :  { %1521 = vmatpush.msra.mxu0 %v552_v5  ;;  %1567 = vmatpush.msra.mxu2 %v616_v6  ;;  %v2149_v5 = vpop.f32.mrf.mxu3  ;;  %v2151_v6 = vpop.f32.mrf.mxu0  ;;  %v598_v23 = vld [vmem:[#allocation5 + $0xe68] sm:$0xff]  ;;  %v632_v15 = vld [vmem:[#allocation5 + $0xf78] sm:$0xff] }
 0x136   :  { %1467 = vmatpush.msrb.mxu1 %v426_v8  ;;  %1513 = vmatpush.msrb.mxu3 %v490_v9  ;;  %v634_v8 = vld [vmem:[#allocation5 + $0xf88] sm:$0xff]  ;;  %v921_v9 = vadd.f32 %v2130_v26, %v898_v58  ;;  %v2158_v26 = vpop.f32.mrf.mxu2  ;;  %v620_v12 = vld [vmem:[#allocation5 + $0xf18] sm:$0xff] }
 0x137   :  { %1468 = vmatmul.f32.vlgmr.msrb.gmra.mxu1 %v1867_v21  ;;  %1514 = vmatmul.f32.vlgmr.msrb.gmra.mxu3 %v1868_v22  ;;  %v630_v21 = vld [vmem:[#allocation5 + $0xf68] sm:$0xff] }
 0x138   :  { %1522 = vmatpush.msra.mxu0 %v550_v16  ;;  %1544 = vmatpush.msra.mxu1 %v584_v17  ;;  %v895_v16 = vadd.f32 %v2117_v51, %v872_v1  ;;  %v532_v17 = vld [vmem:[#allocation5 + $0xc58] sm:$0xff]  ;;  %v944_v22 = vadd.f32 %v2132_v27, %v921_v9  ;;  %v594_v51 = vld [vmem:[#allocation5 + $0xe48] sm:$0xff] }
 0x139   :  { %1568 = vmatpush.msra.mxu2 %v614_v18  ;;  %1590 = vmatpush.msra.mxu3 %v648_v19  ;;  %v566_v18 = vld [vmem:[#allocation5 + $0xd68] sm:$0xff]  ;;  %v2155_v19 = vpop.f32.mrf.mxu1  ;;  %v592_v27 = vld [vmem:[#allocation5 + $0xe38] sm:$0xff] }
 0x13a   :  { %1523 = vmatpush.msra.mxu0 %v548_v24  ;;  %1545 = vmatpush.msra.mxu1 %v582_v25  ;;  %v530_v24 = vld [vmem:[#allocation5 + $0xc48] sm:$0xff]  ;;  %v564_v25 = vld [vmem:[#allocation5 + $0xd58] sm:$0xff] }
 0x13b   :  { %1569 = vmatpush.msra.mxu2 %v612_v28  ;;  %1591 = vmatpush.msra.mxu3 %v646_v29  ;;  %v628_v28 = vld [vmem:[#allocation5 + $0xf58] sm:$0xff]  ;;  %v918_v29 = vadd.f32 %v2120_v63, %v895_v16  ;;  %v590_v63 = vld [vmem:[#allocation5 + $0xe28] sm:$0xff] }
 0x13c   :  { %1524 = vmatpush.msra.mxu0 %v546_v31  ;;  %1546 = vmatpush.msra.mxu1 %v580_v32  ;;  %v562_v31 = vld [vmem:[#allocation5 + $0xd48] sm:$0xff]  ;;  %v712_v1 = vld [vmem:[#allocation5 + $0x11f8] sm:$0xff] }
 0x13d   :  { %1570 = vmatpush.msra.mxu2 %v610_v33  ;;  %1592 = vmatpush.msra.mxu3 %v644_v34  ;;  %v2161_v32 = vpop.f32.mrf.mxu0  ;;  %v626_v33 = vld [vmem:[#allocation5 + $0xf48] sm:$0xff]  ;;  %v967_v34 = vadd.f32 %v2136_v37, %v944_v22  ;;  %v941_v2 = vadd.f32 %v2122_v0, %v918_v29  ;;  %v588_v37 = vld [vmem:[#allocation5 + $0xe18] sm:$0xff] }
 0x13e   :  { %1494 = vmatmul.f32.gmra.mxu2 %v1869_v43  ;;  %1525 = vmatpush.msra.mxu0 %v544_v36  ;;  %v560_v36 = vld [vmem:[#allocation5 + $0xd38] sm:$0xff]  ;;  %v558_v43 = vld [vmem:[#allocation5 + $0xd28] sm:$0xff] }
 0x13f   :  { %1547 = vmatpush.msra.mxu1 %v578_v39  ;;  %1571 = vmatpush.msra.mxu2 %v608_v40  ;;  %v2164_v39 = vpop.f32.mrf.mxu3  ;;  %v624_v40 = vld [vmem:[#allocation5 + $0xf38] sm:$0xff]  ;;  %v622_v44 = vld [vmem:[#allocation5 + $0xf28] sm:$0xff] }
 0x140   :  { %1593 = vmatpush.msra.mxu3 %v642_v41  ;;  %1448 = vmatmul.f32.gmra.mxu0 %v1870_v49  ;;  %v524_v41 = vld [vmem:[#allocation5 + $0xc18] sm:$0xff]  ;;  %v586_v0 = vld [vmem:[#allocation5 + $0xe08] sm:$0xff] }
 0x141   :  { %1517 = vmatmul.f32.gmra.mxu3 %v1871_v52  ;;  %1526 = vmatpush.msra.mxu0 %v542_v38  ;;  %v2167_v38 = vpop.f32.mrf.mxu1  ;;  %v556_v49 = vld [vmem:[#allocation5 + $0xd18] sm:$0xff]  ;;  %v964_v52 = vadd.f32 %v2125_v10, %v941_v2  ;;  %v554_v58 = vld [vmem:[#allocation5 + $0xd08] sm:$0xff]  ;;  %v1874_v10 = vld [vmem:[#allocation2 + $0x70] sm:$0xff] }
 0x142   :  { %1548 = vmatpush.msra.mxu1 %v576_v47  ;;  %1572 = vmatpush.msra.mxu2 %v606_v48  ;;  %v990_v47 = vadd.f32 %v2151_v6, %v967_v34  ;;  %v522_v48 = vld [vmem:[#allocation5 + $0xc08] sm:$0xff]  ;;  %v676_v9 = vld [vmem:[#allocation5 + $0x10d8] sm:$0xff] }
 0x143   :  { %1594 = vmatpush.msra.mxu3 %v640_v50  ;;  %1471 = vmatmul.f32.gmra.mxu1 %v1872_v59  ;;  %v2170_v50 = vpop.f32.mrf.mxu2  ;;  %v618_v59 = vld [vmem:[#allocation5 + $0xf08] sm:$0xff]  ;;  %v704_v34 = vld [vmem:[#allocation5 + $0x11b8] sm:$0xff] }
 0x144   :  { %1527 = vmatpush.msra.mxu0 %v540_v53  ;;  %1549 = vmatpush.msra.mxu1 %v574_v54  ;;  %v680_v53 = vld [vmem:[#allocation5 + $0x10f8] sm:$0xff] }
 0x145   :  { %1573 = vmatpush.msra.mxu2 %v604_v46  ;;  %1595 = vmatpush.msra.mxu3 %v638_v57  ;;  %v744_v54 = vld [vmem:[#allocation5 + $0x12f8] sm:$0xff]  ;;  %v987_v46 = vadd.f32 %v2139_v42, %v964_v52  ;;  %v1013_v57 = vadd.f32 %v2155_v19, %v990_v47  ;;  %v742_v42 = vld [vmem:[#allocation5 + $0x12e8] sm:$0xff] }
 0x146   :  { %1528 = vmatpush.msra.mxu0 %v538_v60  ;;  %1550 = vmatpush.msra.mxu1 %v572_v13  ;;  %v1081_v60 = vpop.f32.mrf.mxu0  ;;  %v738_v19 = vld [vmem:[#allocation5 + $0x12c8] sm:$0xff]  ;;  %v668_v2 = vld [vmem:[#allocation5 + $0x1098] sm:$0xff] }
 0x147   :  { %1574 = vmatpush.msra.mxu2 %v602_v61  ;;  %1596 = vmatpush.msra.mxu3 %v636_v62  ;;  %v2175_v13 = vpop.f32.mrf.mxu3  ;;  %v1873_v61 = vld [vmem:[#allocation2 + $0x60] sm:$0xff]  ;;  %v678_v62 = vld [vmem:[#allocation5 + $0x10e8] sm:$0xff]  ;;  %v1036_v6 = vadd.f32 %v2158_v26, %v1013_v57 }
 0x148   :  { %1529 = vmatpush.msra.mxu0 %v536_v3  ;;  %1551 = vmatpush.msra.mxu1 %v570_v4  ;;  %v776_v3 = vld [vmem:[#allocation5 + $0x13f8] sm:$0xff]  ;;  %v1010_v4 = vadd.f32 %v2143_v55, %v987_v46 }
 0x149   :  { %1575 = vmatpush.msra.mxu2 %v600_v7  ;;  %1597 = vmatpush.msra.mxu3 %v634_v8  ;;  %v1875_v7 = vld [vmem:[#allocation2 + $0x68] sm:$0xff]  ;;  %v1876_v8 = vld [vmem:[#allocation2 + $0x78] sm:$0xff] }
 0x14a   :  { %1530 = vmatpush.msra.mxu0 %v534_v11  ;;  %1552 = vmatpush.msra.mxu1 %v568_v14  ;;  %v710_v11 = vld [vmem:[#allocation5 + $0x11e8] sm:$0xff]  ;;  %v1104_v14 = vpop.f32.mrf.mxu1  ;;  %v1033_v16 = vadd.f32 %v2145_v56, %v1010_v4 }
 0x14b   :  { %1576 = vmatpush.msra.mxu2 %v598_v23  ;;  %1598 = vmatpush.msra.mxu3 %v632_v15  ;;  %v740_v23 = vld [vmem:[#allocation5 + $0x12d8] sm:$0xff]  ;;  %v774_v15 = vld [vmem:[#allocation5 + $0x13e8] sm:$0xff]  ;;  %v1127_v55 = vpop.f32.mrf.mxu2 }
 0x14c   :  { %1531 = vmatpush.msra.mxu0 %v532_v17  ;;  %1553 = vmatpush.msra.mxu1 %v566_v18  ;;  %v674_v17 = vld [vmem:[#allocation5 + $0x10c8] sm:$0xff]  ;;  %v708_v18 = vld [vmem:[#allocation5 + $0x11d8] sm:$0xff]  ;;  %v1056_v56 = vadd.f32 %v2149_v5, %v1033_v16 }
 0x14d   :  { %1577 = vmatpush.msra.mxu2 %v596_v20  ;;  %1599 = vmatpush.msra.mxu3 %v630_v21  ;;  %v772_v20 = vld [vmem:[#allocation5 + $0x13d8] sm:$0xff]  ;;  %v1059_v21 = vadd.f32 %v2164_v39, %v1036_v6  ;;  %v734_v5 = vld [vmem:[#allocation5 + $0x12a8] sm:$0xff] }
 0x14e   :  { %1532 = vmatpush.msra.mxu0 %v530_v24  ;;  %1554 = vmatpush.msra.mxu1 %v564_v25  ;;  %v2181_v22 = vpop.f32.mrf.mxu0  ;;  %v672_v24 = vld [vmem:[#allocation5 + $0x10b8] sm:$0xff]  ;;  %v706_v25 = vld [vmem:[#allocation5 + $0x11c8] sm:$0xff] }
 0x14f   :  { %1578 = vmatpush.msra.mxu2 %v594_v51  ;;  %1600 = vmatpush.msra.mxu3 %v628_v28  ;;  %v1082_v26 = vadd.f32 %v1081_v60, %v1059_v21  ;;  %v736_v51 = vld [vmem:[#allocation5 + $0x12b8] sm:$0xff]  ;;  %v770_v28 = vld [vmem:[#allocation5 + $0x13c8] sm:$0xff]  ;;  %v1150_v29 = vpop.f32.mrf.mxu3 }
 0x150   :  { %1533 = vmatpush.msra.mxu0 %v528_v30  ;;  %1555 = vmatpush.msra.mxu1 %v562_v31  ;;  %v1877_v30 = vld [vmem:[#allocation2 + $0x100] sm:$0xff]  ;;  %v1878_v31 = vld [vmem:[#allocation2 + $0x110] sm:$0xff]  ;;  %v662_v60 = vld [vmem:[#allocation5 + $0x1068] sm:$0xff] }
 0x151   :  { %1579 = vmatpush.msra.mxu2 %v592_v27  ;;  %1601 = vmatpush.msra.mxu3 %v626_v33  ;;  %v1079_v27 = vadd.f32 %v2161_v32, %v1056_v56  ;;  %v670_v33 = vld [vmem:[#allocation5 + $0x10a8] sm:$0xff]  ;;  %v1105_v39 = vadd.f32 %v1104_v14, %v1082_v26  ;;  %v732_v32 = vld [vmem:[#allocation5 + $0x1298] sm:$0xff] }
 0x152   :  { %1534 = vmatpush.msra.mxu0 %v526_v35  ;;  %1556 = vmatpush.msra.mxu1 %v560_v36  ;;  %v2185_v35 = vpop.f32.mrf.mxu1  ;;  %v768_v36 = vld [vmem:[#allocation5 + $0x13b8] sm:$0xff]  ;;  %v654_v21 = vld [vmem:[#allocation5 + $0x1028] sm:$0xff] }
 0x153   :  { %1580 = vmatpush.msra.mxu2 %v590_v63  ;;  %1602 = vmatpush.msra.mxu3 %v624_v40  ;;  %v1879_v63 = vld [vmem:[#allocation2 + $0x108] sm:$0xff]  ;;  %v1880_v40 = vld [vmem:[#allocation2 + $0x118] sm:$0xff]  ;;  %v1128_v47 = vadd.f32 %v1127_v55, %v1105_v39 }
 0x154   :  { %1535 = vmatpush.msra.mxu0 %v524_v41  ;;  %1557 = vmatpush.msra.mxu1 %v558_v43  ;;  %v702_v41 = vld [vmem:[#allocation5 + $0x11a8] sm:$0xff]  ;;  %v2187_v43 = vpop.f32.mrf.mxu2  ;;  %v724_v6 = vld [vmem:[#allocation5 + $0x1258] sm:$0xff] }
 0x155   :  { %1581 = vmatpush.msra.mxu2 %v588_v37  ;;  %1603 = vmatpush.msra.mxu3 %v622_v44  ;;  %v766_v37 = vld [vmem:[#allocation5 + $0x13a8] sm:$0xff]  ;;  %v1102_v44 = vadd.f32 %v2167_v38, %v1079_v27  ;;  %v728_v38 = vld [vmem:[#allocation5 + $0x1278] sm:$0xff] }
 0x156   :  { %1536 = vmatpush.msra.mxu0 %v522_v48  ;;  %1558 = vmatpush.msra.mxu1 %v556_v49  ;;  %v666_v48 = vld [vmem:[#allocation5 + $0x1088] sm:$0xff]  ;;  %v700_v49 = vld [vmem:[#allocation5 + $0x1198] sm:$0xff]  ;;  %v1173_v46 = vpop.f32.mrf.mxu0 }
 0x157   :  { %1582 = vmatpush.msra.mxu2 %v586_v0  ;;  %1604 = vmatpush.msra.mxu3 %v620_v12  ;;  %v730_v0 = vld [vmem:[#allocation5 + $0x1288] sm:$0xff]  ;;  %v764_v12 = vld [vmem:[#allocation5 + $0x1398] sm:$0xff]  ;;  %v1125_v52 = vadd.f32 %v2170_v50, %v1102_v44  ;;  %v2191_v57 = vpop.f32.mrf.mxu3 }
 0x158   :  { %1537 = vmatmul.f32.vlgmr.msra.gmra.mxu0 %v1873_v61  ;;  %1583 = vmatmul.f32.vlgmr.msra.gmra.mxu2 %v1874_v10  ;;  %v696_v61 = vld [vmem:[#allocation5 + $0x1178] sm:$0xff]  ;;  %v726_v10 = vld [vmem:[#allocation5 + $0x1268] sm:$0xff] }
 0x159   :  { %1613 = vmatpush.msrb.mxu0 %v680_v53  ;;  %1659 = vmatpush.msrb.mxu2 %v744_v54  ;;  %v664_v53 = vld [vmem:[#allocation5 + $0x1078] sm:$0xff]  ;;  %v698_v54 = vld [vmem:[#allocation5 + $0x1188] sm:$0xff] }
 0x15a   :  { %1559 = vmatpush.msra.mxu1 %v554_v58  ;;  %1605 = vmatpush.msra.mxu3 %v618_v59  ;;  %v762_v58 = vld [vmem:[#allocation5 + $0x1388] sm:$0xff]  ;;  %v1151_v59 = vadd.f32 %v1150_v29, %v1128_v47  ;;  %v760_v50 = vld [vmem:[#allocation5 + $0x1378] sm:$0xff]  ;;  %v1196_v4 = vpop.f32.mrf.mxu1 }
 0x15b   :  { %1560 = vmatmul.f32.vlgmr.msra.gmra.mxu1 %v1875_v7  ;;  %1606 = vmatmul.f32.vlgmr.msra.gmra.mxu3 %v1876_v8  ;;  %v758_v7 = vld [vmem:[#allocation5 + $0x1368] sm:$0xff]  ;;  %v656_v16 = vld [vmem:[#allocation5 + $0x1038] sm:$0xff] }
 0x15c   :  { %1614 = vmatpush.msrb.mxu0 %v678_v62  ;;  %1636 = vmatpush.msrb.mxu1 %v712_v1  ;;  %v1148_v62 = vadd.f32 %v2175_v13, %v1125_v52  ;;  %v1174_v1 = vadd.f32 %v1173_v46, %v1151_v59  ;;  %v1219_v14 = vpop.f32.mrf.mxu2  ;;  %v722_v13 = vld [vmem:[#allocation5 + $0x1248] sm:$0xff]  ;;  %v752_v56 = vld [vmem:[#allocation5 + $0x1338] sm:$0xff]  ;;  %v1885_v46 = vld [vmem:[#allocation2 + $0x120] sm:$0xff] }
 0x15d   :  { %1660 = vmatpush.msrb.mxu2 %v742_v42  ;;  %1682 = vmatpush.msrb.mxu3 %v776_v3  ;;  %v660_v42 = vld [vmem:[#allocation5 + $0x1058] sm:$0xff]  ;;  %v694_v3 = vld [vmem:[#allocation5 + $0x1168] sm:$0xff] }
 0x15e   :  { %1615 = vmatpush.msrb.mxu0 %v676_v9  ;;  %1637 = vmatpush.msrb.mxu1 %v710_v11  ;;  %v1171_v8 = vadd.f32 %v2181_v22, %v1148_v62  ;;  %v658_v9 = vld [vmem:[#allocation5 + $0x1048] sm:$0xff]  ;;  %v692_v11 = vld [vmem:[#allocation5 + $0x1158] sm:$0xff] }
 0x15f   :  { %1661 = vmatpush.msrb.mxu2 %v740_v23  ;;  %1683 = vmatpush.msrb.mxu3 %v774_v15  ;;  %v756_v23 = vld [vmem:[#allocation5 + $0x1358] sm:$0xff]  ;;  %v1197_v15 = vadd.f32 %v1196_v4, %v1174_v1  ;;  %v754_v55 = vld [vmem:[#allocation5 + $0x1348] sm:$0xff] }
 0x160   :  { %1616 = vmatpush.msrb.mxu0 %v674_v17  ;;  %1638 = vmatpush.msrb.mxu1 %v708_v18  ;;  %v690_v17 = vld [vmem:[#allocation5 + $0x1148] sm:$0xff]  ;;  %v720_v18 = vld [vmem:[#allocation5 + $0x1238] sm:$0xff] }
 0x161   :  { %1662 = vmatpush.msrb.mxu2 %v738_v19  ;;  %1684 = vmatpush.msrb.mxu3 %v772_v20  ;;  %v1194_v19 = vadd.f32 %v2185_v35, %v1171_v8  ;;  %v1220_v20 = vadd.f32 %v1219_v14, %v1197_v15  ;;  %v688_v22 = vld [vmem:[#allocation5 + $0x1138] sm:$0xff]  ;;  %v650_v27 = vld [vmem:[#allocation5 + $0x1008] sm:$0xff] }
 0x162   :  { %1540 = vmatmul.f32.gmra.mxu0 %v1877_v30  ;;  %1586 = vmatmul.f32.gmra.mxu2 %v1878_v31  ;;  %v716_v29 = vld [vmem:[#allocation5 + $0x1218] sm:$0xff]  ;;  %v750_v30 = vld [vmem:[#allocation5 + $0x1328] sm:$0xff] }
 0x163   :  { %1617 = vmatpush.msrb.mxu0 %v672_v24  ;;  %1639 = vmatpush.msrb.mxu1 %v706_v25  ;;  %v1242_v24 = vpop.f32.mrf.mxu3  ;;  %v718_v25 = vld [vmem:[#allocation5 + $0x1228] sm:$0xff]  ;;  %v1217_v26 = vadd.f32 %v2187_v43, %v1194_v19  ;;  %v748_v35 = vld [vmem:[#allocation5 + $0x1318] sm:$0xff]  ;;  %v1882_v43 = vld [vmem:[#allocation2 + $0x90] sm:$0xff] }
 0x164   :  { %1663 = vmatpush.msrb.mxu2 %v736_v51  ;;  %1685 = vmatpush.msrb.mxu3 %v770_v28  ;;  %v652_v51 = vld [vmem:[#allocation5 + $0x1018] sm:$0xff]  ;;  %v686_v28 = vld [vmem:[#allocation5 + $0x1128] sm:$0xff]  ;;  %v1243_v31 = vadd.f32 %v1242_v24, %v1220_v20 }
 0x165   :  { %1563 = vmatmul.f32.gmra.mxu1 %v1879_v63  ;;  %1609 = vmatmul.f32.gmra.mxu3 %v1880_v40  ;;  %v682_v39 = vld [vmem:[#allocation5 + $0x1108] sm:$0xff]  ;;  %v1751_v1 = vld [vmem:[#allocation10 + $0x38] sm:$0xff] }
 0x166   :  { %1618 = vmatpush.msrb.mxu0 %v670_v33  ;;  %1640 = vmatpush.msrb.mxu1 %v704_v34  ;;  %v684_v33 = vld [vmem:[#allocation5 + $0x1118] sm:$0xff]  ;;  %v714_v34 = vld [vmem:[#allocation5 + $0x1208] sm:$0xff]  ;;  %v1707_v63 = vmax.f32 %v1243_v31, 0.0 }
 0x167   :  { %1664 = vmatpush.msrb.mxu2 %v734_v5  ;;  %1686 = vmatpush.msrb.mxu3 %v768_v36  ;;  %v1240_v5 = vadd.f32 %v2191_v57, %v1217_v26  ;;  %v1759_v36 = vld [vmem:[#allocation10 + $0x78] sm:$0xff]  ;;  %v746_v40 = vld [vmem:[#allocation5 + $0x1308] sm:$0xff]  ;;  %v1886_v57 = vld [vmem:[#allocation2 + $0x130] sm:$0xff] }
 0x168   :  { %1619 = vmatpush.msrb.mxu0 %v668_v2  ;;  %1641 = vmatpush.msrb.mxu1 %v702_v41  ;;  %v1711_v2 = vld [vmem:[#allocation8 + $0x10] sm:$0xff]  ;;  %v1881_v41 = vld [vmem:[#allocation2 + $0x80] sm:$0xff]  ;;  %v1883_v47 = vld [vmem:[#allocation2 + $0x88] sm:$0xff] }
 0x169   :  { %1665 = vmatpush.msrb.mxu2 %v732_v32  ;;  %1687 = vmatpush.msrb.mxu3 %v766_v37  ;;  %v1758_v32 = vld [vmem:[#allocation10 + $0x70] sm:$0xff]  ;;  %v1705_v37 = vmax.f32 %v1240_v5, 0.0  ;;  %v1709_v44 = vld [vmem:[#allocation8] sm:$0xff]  ;;  %v1745_v15 = vld [vmem:[#allocation10 + $0x8] sm:$0xff] }
 0x16a   :  { %1620 = vmatpush.msrb.mxu0 %v666_v48  ;;  %1642 = vmatpush.msrb.mxu1 %v700_v49  ;;  %v1757_v48 = vld [vmem:[#allocation10 + $0x68] sm:$0xff]  ;;  %v1715_v49 = vmul.f32 %v1711_v2, %v1707_v63  ;;  %v1748_v8 = vld [vmem:[#allocation10 + $0x20] sm:$0xff] }
 0x16b   :  { %1666 = vmatpush.msrb.mxu2 %v730_v0  ;;  %1688 = vmatpush.msrb.mxu3 %v764_v12  ;;  %v1884_v0 = vld [vmem:[#allocation2 + $0x98] sm:$0xff]  ;;  %v1756_v12 = vld [vmem:[#allocation10 + $0x60] sm:$0xff]  ;;  %v1713_v52 = vmul.f32 %v1709_v44, %v1705_v37 }
 0x16c   :  { %1621 = vmatpush.msrb.mxu0 %v664_v53  ;;  %1643 = vmatpush.msrb.mxu1 %v698_v54  ;;  %v1755_v53 = vld [vmem:[#allocation10 + $0x58] sm:$0xff]  ;;  %v1729_v54 = vrot.slane %v1715_v49, 4  ;;  %v1887_v59 = vld [vmem:[#allocation2 + $0x128] sm:$0xff] }
 0x16d   :  { %1667 = vmatpush.msrb.mxu2 %v728_v38  ;;  %1689 = vmatpush.msrb.mxu3 %v762_v58  ;;  %v1754_v38 = vld [vmem:[#allocation10 + $0x50] sm:$0xff]  ;;  %v1717_v58 = vrot.slane %v1713_v52, 4 }
 0x16e   :  { %1622 = vmatpush.msrb.mxu0 %v662_v60  ;;  %1644 = vmatpush.msrb.mxu1 %v696_v61  ;;  %v1753_v60 = vld [vmem:[#allocation10 + $0x48] sm:$0xff]  ;;  %v1730_v61 = vmax.f32 %v1715_v49, %v1729_v54 }
 0x16f   :  { %1668 = vmatpush.msrb.mxu2 %v726_v10  ;;  %1690 = vmatpush.msrb.mxu3 %v760_v50  ;;  %v1888_v10 = vld [vmem:[#allocation2 + $0x138] sm:$0xff]  ;;  %v1752_v50 = vld [vmem:[#allocation10 + $0x40] sm:$0xff]  ;;  %v1718_v62 = vmax.f32 %v1713_v52, %v1717_v58 }
 0x170   :  { %1623 = vmatpush.msrb.mxu0 %v660_v42  ;;  %1645 = vmatpush.msrb.mxu1 %v694_v3  ;;  %v1731_v42 = vrot.slane %v1730_v61, 2  ;;  %v1750_v3 = vld [vmem:[#allocation10 + $0x30] sm:$0xff]  ;;  %v1775_v52 = vld [vmem:[#allocation10 + $0xf8] sm:$0xff] }
 0x171   :  { %1669 = vmatpush.msrb.mxu2 %v724_v6  ;;  %1691 = vmatpush.msrb.mxu3 %v758_v7  ;;  %v1719_v4 = vrot.slane %v1718_v62, 2  ;;  %v1749_v6 = vld [vmem:[#allocation10 + $0x28] sm:$0xff] }
 0x172   :  { %1624 = vmatpush.msrb.mxu0 %v658_v9  ;;  %1646 = vmatpush.msrb.mxu1 %v692_v11  ;;  %v1732_v7 = vmax.f32 %v1730_v61, %v1731_v42  ;;  %v1747_v11 = vld [vmem:[#allocation10 + $0x18] sm:$0xff] }
 0x173   :  { %1670 = vmatpush.msrb.mxu2 %v722_v13  ;;  %1692 = vmatpush.msrb.mxu3 %v756_v23  ;;  %v1720_v9 = vmax.f32 %v1718_v62, %v1719_v4  ;;  %v1746_v13 = vld [vmem:[#allocation10 + $0x10] sm:$0xff] }
 0x174   :  { %1625 = vmatpush.msrb.mxu0 %v656_v16  ;;  %1647 = vmatpush.msrb.mxu1 %v690_v17  ;;  %v1733_v14 = vrot.slane %v1732_v7, 1  ;;  %v1744_v17 = vld [vmem:[#allocation10] sm:$0xff] }
 0x175   :  { %1671 = vmatpush.msrb.mxu2 %v720_v18  ;;  %1693 = vmatpush.msrb.mxu3 %v754_v55  ;;  %v1721_v23 = vrot.slane %v1720_v9, 1 }
 0x176   :  { %1626 = vmatpush.msrb.mxu0 %v654_v21  ;;  %1648 = vmatpush.msrb.mxu1 %v688_v22  ;;  %v1734_v16 = vmax.f32 %v1732_v7, %v1733_v14  ;;  %v1770_v7 = vld [vmem:[#allocation10 + $0xd0] sm:$0xff] }
 0x177   :  { %1672 = vmatpush.msrb.mxu2 %v718_v25  ;;  %1694 = vmatpush.msrb.mxu3 %v752_v56  ;;  %v1722_v18 = vmax.f32 %v1720_v9, %v1721_v23  ;;  %v780_v25 = vperm.slane %v2113_v45, 2  ;;  %v1769_v9 = vld [vmem:[#allocation10 + $0xc8] sm:$0xff] }
 0x178   :  { %1627 = vmatpush.msrb.mxu0 %v652_v51  ;;  %1649 = vmatpush.msrb.mxu1 %v686_v28 }
 0x179   :  { %1673 = vmatpush.msrb.mxu2 %v716_v29  ;;  %1695 = vmatpush.msrb.mxu3 %v750_v30  ;;  %v1742_v55 = vsel %vm1741_vm0, %v1722_v18, %v1734_v16  ;;  %v784_v51 = vperm.slane %v780_v25, 0  ;;  %v1767_v16 = vld [vmem:[#allocation10 + $0xb8] sm:$0xff] }
 0x17a   :  { %1628 = vmatpush.msrb.mxu0 %v650_v27  ;;  %1650 = vmatpush.msrb.mxu1 %v684_v33 }
 0x17b   :  { %1674 = vmatpush.msrb.mxu2 %v714_v34  ;;  %1696 = vmatpush.msrb.mxu3 %v748_v35 }
 0x17c   :  { %1629 = vmatmul.f32.vlgmr.msrb.gmra.mxu0 %v1881_v41  ;;  %1675 = vmatmul.f32.vlgmr.msrb.gmra.mxu2 %v1882_v43 }
 0x17d   :  { %1777 = vmatpush.msra.mxu0 %v1759_v36  ;;  %1651 = vmatpush.msrb.mxu1 %v682_v39 }
 0x17e   :  { %1697 = vmatpush.msrb.mxu3 %v746_v40  ;;  %1652 = vmatmul.f32.vlgmr.msrb.gmra.mxu1 %v1883_v47 }
 0x17f   :  { %1698 = vmatmul.f32.vlgmr.msrb.gmra.mxu3 %v1884_v0  ;;  %1778 = vmatpush.msra.mxu0 %v1758_v32 }
 0x180   :  { %1797 = vmatpush.msra.mxu1 %v1775_v52 }
 0x181   :  { %1779 = vmatpush.msra.mxu0 %v1757_v48 }
 0x183   :  { %1780 = vmatpush.msra.mxu0 %v1756_v12  ;;  %v1262_v19 = vpop.f32.mrf.mxu0 }
 0x184   :  { %1632 = vmatmul.f32.gmra.mxu0 %v1885_v46  ;;  %1678 = vmatmul.f32.gmra.mxu2 %v1886_v57  ;;  %v1263_v29 = vadd.f32 %v1262_v19, %v784_v51 }
 0x185   :  { %1781 = vmatpush.msra.mxu0 %v1755_v53 }
 0x186   :  { %1655 = vmatmul.f32.gmra.mxu1 %v1887_v59  ;;  %v1285_v20 = vpop.f32.mrf.mxu1 }
 0x187   :  { %1701 = vmatmul.f32.gmra.mxu3 %v1888_v10  ;;  %1782 = vmatpush.msra.mxu0 %v1754_v38  ;;  %v1308_v21 = vpop.f32.mrf.mxu2  ;;  %v1286_v27 = vadd.f32 %v1285_v20, %v1263_v29  ;;  %v1774_v38 = vld [vmem:[#allocation10 + $0xf0] sm:$0xff]  ;;  %v1772_v10 = vld [vmem:[#allocation10 + $0xe0] sm:$0xff] }
 0x188   :  { %1798 = vmatpush.msra.mxu1 %v1774_v38  ;;  %v1712_v38 = vld [vmem:[#allocation8 + $0x18] sm:$0xff] }
 0x189   :  { %1783 = vmatpush.msra.mxu0 %v1753_v60  ;;  %v1309_v35 = vadd.f32 %v1308_v21, %v1286_v27  ;;  %v1773_v60 = vld [vmem:[#allocation10 + $0xe8] sm:$0xff] }
 0x18a   :  { %v1331_v22 = vpop.f32.mrf.mxu3  ;;  %1799 = vmatpush.msra.mxu1 %v1773_v60  ;;  %v1765_v21 = vld [vmem:[#allocation10 + $0xa8] sm:$0xff] }
 0x18b   :  { %1784 = vmatpush.msra.mxu0 %v1752_v50  ;;  %v1332_v40 = vadd.f32 %v1331_v22, %v1309_v35  ;;  %v1761_v35 = vld [vmem:[#allocation10 + $0x88] sm:$0xff] }
 0x18c   :  { %1800 = vmatpush.msra.mxu1 %v1772_v10 }
 0x18d   :  { %1785 = vmatpush.msra.mxu0 %v1751_v1  ;;  %v1265_v24 = vpop.f32.mrf.mxu0  ;;  %v1771_v1 = vld [vmem:[#allocation10 + $0xd8] sm:$0xff] }
 0x18e   :  { %v1266_v33 = vadd.f32 %v1265_v24, %v784_v51  ;;  %1801 = vmatpush.msra.mxu1 %v1771_v1  ;;  %v1763_v51 = vld [vmem:[#allocation10 + $0x98] sm:$0xff] }
 0x18f   :  { %1786 = vmatpush.msra.mxu0 %v1750_v3 }
 0x190   :  { %v1288_v56 = vpop.f32.mrf.mxu1  ;;  %1802 = vmatpush.msra.mxu1 %v1770_v7 }
 0x191   :  { %1787 = vmatpush.msra.mxu0 %v1749_v6  ;;  %v1311_v26 = vpop.f32.mrf.mxu2  ;;  %v1289_v5 = vadd.f32 %v1288_v56, %v1266_v33  ;;  %v1764_v56 = vld [vmem:[#allocation10 + $0xa0] sm:$0xff] }
 0x192   :  { %1803 = vmatpush.msra.mxu1 %v1769_v9 }
 0x193   :  { %1788 = vmatpush.msra.mxu0 %v1748_v8  ;;  %v1312_v2 = vadd.f32 %v1311_v26, %v1289_v5  ;;  %v1760_v5 = vld [vmem:[#allocation10 + $0x80] sm:$0xff] }
 0x194   :  { %v1334_v28 = vpop.f32.mrf.mxu3 }
 0x195   :  { %1789 = vmatpush.msra.mxu0 %v1747_v11  ;;  %v1335_v43 = vadd.f32 %v1334_v28, %v1312_v2 }
 0x197   :  { %1790 = vmatpush.msra.mxu0 %v1746_v13  ;;  %v1354_v30 = vpop.f32.mrf.mxu0  ;;  %v1768_v13 = vld [vmem:[#allocation10 + $0xc0] sm:$0xff] }
 0x198   :  { %v1355_v45 = vadd.f32 %v1354_v30, %v1332_v40  ;;  %1804 = vmatpush.msra.mxu1 %v1768_v13  ;;  %v1762_v30 = vld [vmem:[#allocation10 + $0x90] sm:$0xff] }
 0x199   :  { %1791 = vmatpush.msra.mxu0 %v1745_v15 }
 0x19a   :  { %v1377_v31 = vpop.f32.mrf.mxu1  ;;  %1805 = vmatpush.msra.mxu1 %v1767_v16 }
 0x19b   :  { %1792 = vmatpush.msra.mxu0 %v1744_v17  ;;  %v1400_v34 = vpop.f32.mrf.mxu2  ;;  %v1378_v44 = vadd.f32 %v1377_v31, %v1355_v45 }
 0x19c   :  { %1793 = vmatmul.f32.vlgmr.msra.gmra.mxu0 %v1742_v55  ;;  %v1766_v55 = vld [vmem:[#allocation10 + $0xb0] sm:$0xff] }
 0x19d   :  { %v1401_v0 = vadd.f32 %v1400_v34, %v1378_v44  ;;  %1806 = vmatpush.msra.mxu1 %v1766_v55 }
 0x19e   :  { %v1423_v36 = vpop.f32.mrf.mxu3 }
 0x19f   :  { %v1424_v46 = vadd.f32 %v1423_v36, %v1401_v0  ;;  %1807 = vmatpush.msra.mxu1 %v1765_v21 }
 0x1a1   :  { %1808 = vmatpush.msra.mxu1 %v1764_v56 }
 0x1a3   :  { %1809 = vmatpush.msra.mxu1 %v1763_v51 }
 0x1a5   :  { %1810 = vmatpush.msra.mxu1 %v1762_v30 }
 0x1a7   :  { %v1357_v39 = vpop.f32.mrf.mxu0  ;;  %1811 = vmatpush.msra.mxu1 %v1761_v35 }
 0x1a8   :  { %v1358_v47 = vadd.f32 %v1357_v39, %v1335_v43 }
 0x1a9   :  { %1812 = vmatpush.msra.mxu1 %v1760_v5 }
 0x1aa   :  { %v1380_v63 = vpop.f32.mrf.mxu1 }
 0x1ab   :  { %v1381_v12 = vadd.f32 %v1380_v63, %v1358_v47  ;;  %v1710_v47 = vld [vmem:[#allocation8 + $0x8] sm:$0xff] }
 0x1ad   :  { %v1403_v41 = vpop.f32.mrf.mxu2 }
 0x1ae   :  { %v1404_v57 = vadd.f32 %v1403_v41, %v1381_v12 }
 0x1b0   :  { %v1426_v32 = vpop.f32.mrf.mxu3 }
 0x1b1   :  { %v1446_v37 = vpop.f32.mrf.mxu0  ;;  %v1427_v61 = vadd.f32 %v1426_v32, %v1404_v57 }
 0x1b2   :  { %v1447_v59 = vadd.f32 %v1446_v37, %v1424_v46 }
 0x1b4   :  { %v1469_v48 = vpop.f32.mrf.mxu1 }
 0x1b5   :  { %v1470_v62 = vadd.f32 %v1469_v48, %v1447_v59 }
 0x1b7   :  { %v1492_v49 = vpop.f32.mrf.mxu2 }
 0x1b8   :  { %v1493_v3 = vadd.f32 %v1492_v49, %v1470_v62 }
 0x1ba   :  { %v1515_v53 = vpop.f32.mrf.mxu3 }
 0x1bb   :  { %v1516_v11 = vadd.f32 %v1515_v53, %v1493_v3 }
 0x1bd   :  { %v1449_v54 = vpop.f32.mrf.mxu0 }
 0x1be   :  { %v1450_v4 = vadd.f32 %v1449_v54, %v1427_v61 }
 0x1c0   :  { %v1472_v58 = vpop.f32.mrf.mxu1 }
 0x1c1   :  { %v1495_v50 = vpop.f32.mrf.mxu2  ;;  %v1473_v14 = vadd.f32 %v1472_v58, %v1450_v4 }
 0x1c3   :  { %v1496_v17 = vadd.f32 %v1495_v50, %v1473_v14 }
 0x1c4   :  { %v1518_v6 = vpop.f32.mrf.mxu3 }
 0x1c5   :  { %v1519_v24 = vadd.f32 %v1518_v6, %v1496_v17 }
 0x1d5   :  { %v1538_v42 = vpop.f32.mrf.mxu0 }
 0x1d6   :  { %v1539_v15 = vadd.f32 %v1538_v42, %v1516_v11 }
 0x1d8   :  { %v1561_v8 = vpop.f32.mrf.mxu1 }
 0x1d9   :  { %v1562_v20 = vadd.f32 %v1561_v8, %v1539_v15  ;;  %v1889_v8 = vld [vmem:[#allocation7] sm:$0xf] }
 0x1da   :  { %v1776_v9 = vperm.slane %v1889_v8, 1 }
 0x1db   :  { %v1584_v23 = vpop.f32.mrf.mxu2 }
 0x1dc   :  { %v1585_v25 = vadd.f32 %v1584_v23, %v1562_v20 }
 0x1de   :  { %v1607_v18 = vpop.f32.mrf.mxu3 }
 0x1df   :  { %v1541_v19 = vpop.f32.mrf.mxu0  ;;  %v1608_v29 = vadd.f32 %v1607_v18, %v1585_v25 }
 0x1e0   :  { %v1542_v26 = vadd.f32 %v1541_v19, %v1519_v24 }
 0x1e2   :  { %v1564_v22 = vpop.f32.mrf.mxu1 }
 0x1e3   :  { %v1565_v27 = vadd.f32 %v1564_v22, %v1542_v26 }
 0x1e5   :  { %v1587_v28 = vpop.f32.mrf.mxu2 }
 0x1e6   :  { %v1588_v39 = vadd.f32 %v1587_v28, %v1565_v27 }
 0x1e8   :  { %v1610_v33 = vpop.f32.mrf.mxu3 }
 0x1e9   :  { %v1611_v2 = vadd.f32 %v1610_v33, %v1588_v39 }
 0x1f9   :  { %v1630_v31 = vpop.f32.mrf.mxu0 }
 0x1fa   :  { %v1631_v34 = vadd.f32 %v1630_v31, %v1608_v29 }
 0x1fb   :  { %v1653_v36 = vpop.f32.mrf.mxu1 }
 0x1fc   :  { %v1654_v63 = vadd.f32 %v1653_v36, %v1631_v34 }
 0x1ff   :  { %v1676_v40 = vpop.f32.mrf.mxu2 }
 0x200   :  { %v1677_v41 = vadd.f32 %v1676_v40, %v1654_v63 }
 0x201   :  { %v1633_v43 = vpop.f32.mrf.mxu0 }
 0x202   :  { %v1634_v45 = vadd.f32 %v1633_v43, %v1611_v2  ;;  %v1699_v32 = vpop.f32.mrf.mxu3 }
 0x203   :  { %v1700_v37 = vadd.f32 %v1699_v32, %v1677_v41  ;;  %v1656_v44 = vpop.f32.mrf.mxu1 }
 0x204   :  { %v1657_v49 = vadd.f32 %v1656_v44, %v1634_v45 }
 0x205   :  { %v1706_v48 = vmax.f32 %v1700_v37, 0.0 }
 0x207   :  { %v1714_v0 = vmul.f32 %v1710_v47, %v1706_v48  ;;  %v1679_v12 = vpop.f32.mrf.mxu2 }
 0x208   :  { %v1680_v52 = vadd.f32 %v1679_v12, %v1657_v49 }
 0x209   :  { %v1723_v53 = vrot.slane %v1714_v0, 4 }
 0x20a   :  { %v1702_v54 = vpop.f32.mrf.mxu3 }
 0x20b   :  { %v1724_v46 = vmax.f32 %v1714_v0, %v1723_v53  ;;  %v1703_v57 = vadd.f32 %v1702_v54, %v1680_v52 }
 0x20d   :  { %v1708_v58 = vmax.f32 %v1703_v57, 0.0  ;;  %v1725_v59 = vrot.slane %v1724_v46, 2 }
 0x20f   :  { %v1716_v60 = vmul.f32 %v1712_v38, %v1708_v58  ;;  %v1726_v10 = vmax.f32 %v1724_v46, %v1725_v59 }
 0x211   :  { %v1735_v61 = vrot.slane %v1716_v60, 4  ;;  %v1727_v1 = vrot.slane %v1726_v10, 1 }
 0x213   :  { %v1736_v50 = vmax.f32 %v1716_v60, %v1735_v61  ;;  %v1728_v4 = vmax.f32 %v1726_v10, %v1727_v1 }
 0x215   :  { %v1737_v62 = vrot.slane %v1736_v50, 2 }
 0x217   :  { %v1738_v42 = vmax.f32 %v1736_v50, %v1737_v62 }
 0x219   :  { %v1739_v3 = vrot.slane %v1738_v42, 1  ;;  %v1794_v11 = vpop.f32.mrf.mxu0 }
 0x21a   :  { %v1795_v14 = vadd.f32 %v1794_v11, %v1776_v9 }
 0x21b   :  { %v1740_v6 = vmax.f32 %v1738_v42, %v1739_v3 }
 0x21d   :  { %v1743_v7 = vsel %vm1741_vm0, %v1728_v4, %v1740_v6 }
 0x21e   :  { %1813 = vmatmul.f32.vlgmr.msra.gmra.mxu1 %v1743_v7 }
 0x29b   :  { %v1814_v13 = vpop.f32.mrf.mxu1 }
 0x29c   :  { %v1815_v23 = vadd.f32 %v1814_v13, %v1795_v14 }
 0x29e   :  { %1817 = vst [vmem:[#allocation11] sm:$0x3] %v1815_v23 }
 0x29f   :  { %1828 = dma.vmem_to_hbm [thread:$0]  %s1824_s4, 32, %s1826_s23, [#allocation4]  }
 0x2a0   :  { %2040 = dma.done.wait [#allocation4], 32  }
 0x2a1   :  { %2041 = vsyncadd [#allocation4], 4294967264 }
 0x2a2   :  { %1833 = vsyncpa [#allocation3], 1 }
 0x2a3   :  { %1834 = vsyncpa [#allocation6], 1 }
 0x2a4   :  { %1835 = vsyncpa [#allocation9], 1 }
 0x2a5   :  { %1836 = vsyncpa [#allocation4], 1 }

</bundles_post_ra>
